<compile_context>
chip_gen: v7x
topology: tpu7x:2x2x1
jax: 0.10.0
libtpu: 0.0.40
codegen_flags: <defaults>
</compile_context>

<pallas_src>
import functools

import jax
import jax.numpy as jnp
from jax import lax
from jax.experimental import pallas as pl
from jax.experimental.pallas import tpu as pltpu


def _global_attn_kernel(true_d, n_rows, tile_n,
                        x_init_ref, wkv_ref, whk_ref, vecs_ref,
                        wout_ref, small_ref, masks_ref,
                        y_ref,
                        kv_acc, ksum_acc, ndrhs_ref, cnt_ref):
    # x_init_ref is aliased to y_ref (input_output_aliases) — the carry is read
    # and written exclusively through y_ref (HBM, bf16).
    del x_init_ref
    dp = masks_ref.shape[0]
    num_tiles = y_ref.shape[0] // tile_n

    # ---------------- pass 1: accumulate per-head kv and ksum ----------------
    kv_acc[...] = jnp.zeros_like(kv_acc)
    ksum_acc[...] = jnp.zeros_like(ksum_acc)
    cnt_ref[0] = 0

    w_kv = wkv_ref[...]                       # (Dp, 2Dp) bf16 : [Wk | Wv]
    b_kv = vecs_ref[0:1, :]                   # (1, 2Dp) f32   : [bk | bv]

    def pass1(x_tile_ref):
        t = cnt_ref[0]
        cnt_ref[0] = t + 1
        xb = x_tile_ref[...]                  # (tile_n, Dp) bf16, padded lanes = 0
        kvp = jnp.dot(xb, w_kv, preferred_element_type=jnp.float32) + b_kv
        k = jax.nn.sigmoid(kvp[:, :dp])
        v = kvp[:, dp:]
        # zero rows beyond the true N (tail-tile padding) before accumulating
        row = lax.broadcasted_iota(jnp.int32, (tile_n, dp), 0) + t * tile_n
        live = row < n_rows
        k = jnp.where(live, k, 0.0)
        v = jnp.where(live, v, 0.0)
        kv_acc[...] += lax.dot_general(
            k.astype(jnp.bfloat16), v.astype(jnp.bfloat16),
            (((0,), (0,)), ((), ())), preferred_element_type=jnp.float32)
        ksum_acc[...] += jnp.sum(k, axis=0, keepdims=True)

    pltpu.emit_pipeline(
        pass1,
        grid=(num_tiles,),
        in_specs=[pl.BlockSpec((tile_n, dp), lambda t: (t, 0))],
    )(y_ref)

    # ------------- fused num/den RHS (per-head mask, pre-scaled 1/N) ---------
    mask_s = masks_ref[...]                   # (Dp, Dp) f32 = head-mask / N
    ndrhs_ref[:, :dp] = (kv_acc[...] * mask_s).astype(jnp.bfloat16)
    # den_rhs[d, j] = mask[d, j] * ksum[d]; mask is symmetric -> transpose trick.
    ndrhs_ref[:, dp:] = jnp.transpose(mask_s * ksum_acc[...]).astype(jnp.bfloat16)
    nd_rhs = ndrhs_ref[...]                   # (Dp, 2Dp) bf16

    b_hk = vecs_ref[1:2, :]                   # (1, 2Dp) : [bh | bk]
    lng = vecs_ref[2:3, :dp]
    lnb = vecs_ref[2:3, dp:]
    beta = vecs_ref[3:4, :dp]
    bout = small_ref[0:1, :]
    pad_lane = small_ref[1:2, :]              # 1 on padded feature lanes
    live_lane = small_ref[2:3, :]             # 1 on true feature lanes
    w_hk = whk_ref[...]                       # (Dp, 2Dp) bf16 : [Wh | Wk]
    w_out = wout_ref[...]                     # (Dp, Dp)  bf16 (shared)
    inv_d = 1.0 / true_d

    # -------- pass 2: per-tile read-out, LayerNorm, gate, out projection -----
    def pass2(x_tile_ref, y_tile_ref):
        xb = x_tile_ref[...]
        hk = jnp.dot(xb, w_hk, preferred_element_type=jnp.float32) + b_hk
        h = hk[:, :dp]
        k = jax.nn.sigmoid(hk[:, dp:])
        nd = jnp.dot(k.astype(jnp.bfloat16), nd_rhs,
                     preferred_element_type=jnp.float32)      # (tile_n, 2Dp)
        num = nd[:, :dp]
        den = nd[:, dp:] + pad_lane           # padded lanes: num = 0, den = 1
        attn = num * pl.reciprocal(den, approx=True)
        # LayerNorm over the true feature width (centered two-pass statistics).
        mu = jnp.sum(attn, axis=1, keepdims=True) * inv_d
        diff = (attn - mu) * live_lane
        var = jnp.sum(diff * diff, axis=1, keepdims=True) * inv_d
        xn = diff * lax.rsqrt(var + 1e-5) * lng + lnb
        x2 = xn * (h + beta)
        x3 = jnp.dot(x2.astype(jnp.bfloat16), w_out,
                     preferred_element_type=jnp.float32) + bout
        y_tile_ref[...] = jnp.maximum(x3, 0.0).astype(jnp.bfloat16)

    pltpu.emit_pipeline(
        pass2,
        grid=(num_tiles,),
        in_specs=[pl.BlockSpec((tile_n, dp), lambda t: (t, 0))],
        out_specs=[pl.BlockSpec((tile_n, dp), lambda t: (t, 0))],
    )(y_ref, y_ref)


def global_attn_pallas(x, params, *, heads, hidden):
    N, D = x.shape
    L = params["wh"].shape[0]
    Dp = ((D + 127) // 128) * 128            # lane-dense padded feature width

    # row tiling: big lane/sublane-friendly tiles, padded N handled by masking
    TILE_N = 512 if N >= 512 else ((N + 7) // 8) * 8
    Npad = ((N + TILE_N - 1) // TILE_N) * TILE_N

    # head-major permutation: new col h*hidden + d  <-  original col d*heads + h
    perm = jnp.arange(D).reshape(hidden, heads).T.reshape(-1)
    inv_perm = jnp.argsort(perm)

    def pad_mats(w):                          # (L, D, D) -> (L, Dp, Dp)
        wp = w[:, perm, :][:, :, perm]
        return jnp.zeros((L, Dp, Dp), w.dtype).at[:, :D, :D].set(wp)

    def pad_vec(b):                           # (L, D) -> (L, Dp)
        return jnp.zeros((L, Dp), b.dtype).at[:, :D].set(b[:, perm])

    wk_p = pad_mats(params["wk"])
    wv_p = pad_mats(params["wv"])
    wh_p = pad_mats(params["wh"])
    wkv_all = jnp.concatenate([wk_p, wv_p], axis=2).astype(jnp.bfloat16)
    whk_all = jnp.concatenate([wh_p, wk_p], axis=2).astype(jnp.bfloat16)

    bk = pad_vec(params["bk"]); bv = pad_vec(params["bv"]); bh = pad_vec(params["bh"])
    lng = pad_vec(params["lng"]); lnb = pad_vec(params["lnb"])
    bet = pad_vec(params["betas"])            # pre-activate (sigmoid) if beta < 0
    vecs = jnp.zeros((L, 8, 2 * Dp), jnp.float32)
    vecs = vecs.at[:, 0, :Dp].set(bk).at[:, 0, Dp:].set(bv)
    vecs = vecs.at[:, 1, :Dp].set(bh).at[:, 1, Dp:].set(bk)
    vecs = vecs.at[:, 2, :Dp].set(lng).at[:, 2, Dp:].set(lnb)
    vecs = vecs.at[:, 3, :Dp].set(bet)

    wout_p = jnp.zeros((Dp, Dp), jnp.float32).at[:D, :D].set(
        params["wout"][perm][:, perm]).astype(jnp.bfloat16)

    col = jnp.arange(Dp)
    lane_valid = col < D
    head_id = col // hidden
    mask = ((head_id[:, None] == head_id[None, :])
            & lane_valid[:, None] & lane_valid[None, :]).astype(jnp.float32)
    mask_s = mask * (1.0 / float(N))          # 1/N keeps kv/ksum O(1) for bf16
    small = jnp.zeros((8, Dp), jnp.float32)
    small = small.at[0, :D].set(params["bout"][perm])
    small = small.at[1].set((~lane_valid).astype(jnp.float32))
    small = small.at[2].set(lane_valid.astype(jnp.float32))

    # bf16 layer carry, seeded from the padded head-major input via aliasing
    x_p = jnp.zeros((Npad, Dp), jnp.bfloat16).at[:N, :D].set(
        x[:, perm].astype(jnp.bfloat16))

    layer_w = pl.BlockSpec((pl.Squeezed(), Dp, 2 * Dp), lambda l: (l, 0, 0))
    layer_v = pl.BlockSpec((pl.Squeezed(), 8, 2 * Dp), lambda l: (l, 0, 0))
    shared_m = pl.BlockSpec((Dp, Dp), lambda l: (0, 0))
    shared_s = pl.BlockSpec((8, Dp), lambda l: (0, 0))

    flops = int(16 * L * Npad * Dp * Dp)
    transcendentals = int(3 * L * Npad * Dp)
    bytes_accessed = int(Npad * Dp * 2                       # input seed
                         + 3 * L * Npad * Dp * 2             # carry: 2 reads + 1 write
                         + L * (2 * Dp * 2 * Dp * 2 + 8 * 2 * Dp * 4)
                         + Dp * Dp * 2 + 8 * Dp * 4 + Dp * Dp * 4)

    out = pl.pallas_call(
        functools.partial(_global_attn_kernel, D, N, TILE_N),
        out_shape=jax.ShapeDtypeStruct((Npad, Dp), jnp.bfloat16),
        grid_spec=pltpu.PrefetchScalarGridSpec(
            num_scalar_prefetch=0,
            grid=(L,),
            in_specs=[
                pl.BlockSpec(memory_space=pl.ANY),   # x seed (aliased to output)
                layer_w,                             # [Wk | Wv]  (pass 1)
                layer_w,                             # [Wh | Wk]  (pass 2)
                layer_v,                             # packed per-layer vectors
                shared_m,                            # W_out (shared)
                shared_s,                            # bout / pad / valid lanes
                shared_m,                            # head mask / N
            ],
            out_specs=pl.BlockSpec(memory_space=pl.ANY),     # HBM layer carry
            scratch_shapes=[
                pltpu.VMEM((Dp, Dp), jnp.float32),           # kv accumulator
                pltpu.VMEM((1, Dp), jnp.float32),            # ksum accumulator
                pltpu.VMEM((Dp, 2 * Dp), jnp.bfloat16),      # fused num/den RHS
                pltpu.SMEM((1,), jnp.int32),                 # row-tile counter
            ],
        ),
        input_output_aliases={0: 0},
        compiler_params=pltpu.CompilerParams(
            dimension_semantics=("arbitrary",),              # layer carry
            vmem_limit_bytes=48 * 1024 * 1024),              # <= v7x 64 MiB VMEM
        cost_estimate=pl.CostEstimate(flops=flops,
                                      transcendentals=transcendentals,
                                      bytes_accessed=bytes_accessed),
    )(x_p, wkv_all, whk_all, vecs, wout_p, small, mask_s)

    return out[:N, :D][:, inv_perm].astype(jnp.float32)


def global_attn_ref(x, params, heads, hidden):
    """Pure-JAX replica of the torch forward (original layout), f32 'highest'."""
    P = jax.lax.Precision.HIGHEST
    N, D = x.shape
    L = params["wh"].shape[0]
    for i in range(L):
        h = jnp.dot(x, params["wh"][i], precision=P) + params["bh"][i]
        k = jax.nn.sigmoid(jnp.dot(x, params["wk"][i], precision=P)
                           + params["bk"][i]).reshape(N, hidden, heads)
        v = (jnp.dot(x, params["wv"][i], precision=P)
             + params["bv"][i]).reshape(N, hidden, heads)
        kv = jnp.einsum('ndh,nmh->dmh', k, v, precision=P)
        num = jnp.einsum('ndh,dmh->nmh', k, kv, precision=P)
        ksum = jnp.einsum('ndh->dh', k)
        den = jnp.einsum('ndh,dh->nh', k, ksum, precision=P)[:, None, :]
        xa = (num / den).reshape(N, D)
        mu = xa.mean(-1, keepdims=True)
        var = ((xa - mu) ** 2).mean(-1, keepdims=True)
        xn = (xa - mu) / jnp.sqrt(var + 1e-5) * params["lng"][i] + params["lnb"][i]
        x = xn * (h + params["betas"][i][None])
        x = jnp.maximum(jnp.dot(x, params["wout"], precision=P) + params["bout"], 0.0)
    return x


def init_params(key, D, L, beta):
    ks = jax.random.split(key, 8)
    bound = 1.0 / (D ** 0.5)
    u = lambda k, shape: jax.random.uniform(k, shape, jnp.float32, -bound, bound)
    return dict(
        wh=u(ks[0], (L, D, D)), bh=u(ks[1], (L, D)),
        wk=u(ks[2], (L, D, D)), bk=u(ks[3], (L, D)),
        wv=u(ks[4], (L, D, D)), bv=u(ks[5], (L, D)),
        lng=jnp.ones((L, D), jnp.float32),
        lnb=jnp.zeros((L, D), jnp.float32),
        betas=jnp.full((L, D), beta, jnp.float32),   # beta >= 0 branch
        wout=u(ks[6], (D, D)), bout=u(ks[7], (D,)),
    )


if __name__ == "__main__":
    hidden_channels, heads, num_layers, beta = 32, 2, 2, 0.5
    D = heads * hidden_channels
    seq_len = 64

    key = jax.random.PRNGKey(0)
    kx, kp = jax.random.split(key)
    x = jax.random.normal(kx, (seq_len, D), jnp.float32)
    params = init_params(kp, D, num_layers, beta)

    fn = jax.jit(global_attn_pallas, static_argnames=("heads", "hidden"))
    out = fn(x, params, heads=heads, hidden=hidden_channels)
    out = jax.block_until_ready(out)

    ref = global_attn_ref(x, params, heads, hidden_channels)
    err = float(jnp.max(jnp.abs(out - ref)))
    # End-to-end bf16 path (bf16 MXU operands + bf16 HBM layer carry) vs. a
    # full-f32 'highest' reference: budget ~ sqrt(K)*2^-8 per matmul plus one
    # bf16 rounding of the carry per layer.
    assert err < 8e-2, f"kernel/reference mismatch, max abs err = {err}"
    print("KERNEL_OK")
</pallas_src>

<mosaic_0001>
module attributes {stable_mosaic.version = 11 : i64} {
  func.func @_global_attn_kernel(%arg0: i32, %arg1: memref<64x128xbf16, #tpu.memory_space<any>>, %arg2: memref<1x128x256xbf16, #tpu.memory_space<vmem>>, %arg3: memref<1x128x256xbf16, #tpu.memory_space<vmem>>, %arg4: memref<1x8x256xf32, #tpu.memory_space<vmem>>, %arg5: memref<128x128xbf16, #tpu.memory_space<vmem>>, %arg6: memref<8x128xf32, #tpu.memory_space<vmem>>, %arg7: memref<128x128xf32, #tpu.memory_space<vmem>>, %arg8: memref<64x128xbf16, #tpu.memory_space<any>>, %arg9: memref<128x128xf32, #tpu.memory_space<vmem>>, %arg10: memref<1x128xf32, #tpu.memory_space<vmem>>, %arg11: memref<128x256xbf16, #tpu.memory_space<vmem>>, %arg12: memref<1xi32, #tpu.memory_space<smem>>) attributes {dimension_semantics = [#tpu.dimension_semantics<arbitrary>], iteration_bounds = array<i64: 2>, scalar_prefetch = 0 : i64, scratch_operands = 4 : i64, tpu.core_type = #tpu.core_type<tc>, window_params = [{}, {transform_indices = @transform_1, window_bounds = array<i64: 1, 128, 256>}, {transform_indices = @transform_2, window_bounds = array<i64: 1, 128, 256>}, {transform_indices = @transform_3, window_bounds = array<i64: 1, 8, 256>}, {pipeline_mode = #tpu.pipeline_mode<synchronous>, transform_indices = @transform_4, window_bounds = array<i64: 128, 128>}, {pipeline_mode = #tpu.pipeline_mode<synchronous>, transform_indices = @transform_5, window_bounds = array<i64: 8, 128>}, {pipeline_mode = #tpu.pipeline_mode<synchronous>, transform_indices = @transform_6, window_bounds = array<i64: 128, 128>}, {}]} {
    %cst = arith.constant 0.000000e+00 : f32
    %0 = vector.broadcast %cst : f32 to vector<128x128xf32>
    %c0 = arith.constant 0 : index
    %c0_0 = arith.constant 0 : index
    %1 = vector.load %arg9[%c0, %c0_0] : memref<128x128xf32, #tpu.memory_space<vmem>>, vector<128x128xf32>
    tpu.vector_store %arg9[%c0, %c0_0], %0 {strides = array<i32>} : memref<128x128xf32, #tpu.memory_space<vmem>>, vector<128x128xf32>,
    %cst_1 = arith.constant 0.000000e+00 : f32
    %2 = vector.broadcast %cst_1 : f32 to vector<1x128xf32>
    %c0_2 = arith.constant 0 : index
    %c0_3 = arith.constant 0 : index
    %3 = vector.load %arg10[%c0_2, %c0_3] : memref<1x128xf32, #tpu.memory_space<vmem>>, vector<1x128xf32>
    tpu.vector_store %arg10[%c0_2, %c0_3], %2 {strides = array<i32>} : memref<1x128xf32, #tpu.memory_space<vmem>>, vector<1x128xf32>,
    %c0_i32 = arith.constant 0 : i32
    %c0_4 = arith.constant 0 : index
    %4 = memref.load %arg12[%c0_4] : memref<1xi32, #tpu.memory_space<smem>>
    memref.store %c0_i32, %arg12[%c0_4] : memref<1xi32, #tpu.memory_space<smem>>
    %c0_5 = arith.constant 0 : index
    %c0_6 = arith.constant 0 : index
    %c0_7 = arith.constant 0 : index
    %5 = vector.load %arg2[%c0_5, %c0_6, %c0_7] : memref<1x128x256xbf16, #tpu.memory_space<vmem>>, vector<1x128x256xbf16>
    %6 = vector.shape_cast %5 : vector<1x128x256xbf16> to vector<128x256xbf16>
    %c0_8 = arith.constant 0 : index
    %c0_9 = arith.constant 0 : index
    %c0_10 = arith.constant 0 : index
    %7 = vector.load %arg4[%c0_8, %c0_9, %c0_10] : memref<1x8x256xf32, #tpu.memory_space<vmem>>, vector<1x1x256xf32>
    %8 = vector.shape_cast %7 : vector<1x1x256xf32> to vector<1x256xf32>
    %c1_i32 = arith.constant 1 : i32
    %c1_i32_11 = arith.constant 1 : i32
    %9 = arith.muli %c1_i32, %c1_i32_11 : i32
    "tpu.region"() ({
      %alloca = memref.alloca() : memref<64x128xbf16, #tpu.memory_space<vmem>>
      %c0_i32_45 = arith.constant 0 : i32
      %37 = arith.cmpi sgt, %9, %c0_i32_45 : i32
      %38 = arith.extui %37 : i1 to i32
      %c0_i32_46 = arith.constant 0 : i32
      %39 = arith.cmpi ne, %38, %c0_i32_46 : i32
      scf.if %39 {
        %c1_i32_47 = arith.constant 1 : i32
        %c1_i32_48 = arith.constant 1 : i32
        %40 = arith.muli %c1_i32_47, %c1_i32_48 : i32
        %c1_i32_49 = arith.constant 1 : i32
        %41 = arith.subi %40, %c1_i32_49 : i32
        %c0_i32_50 = arith.constant 0 : i32
        %42 = arith.cmpi eq, %41, %c0_i32_50 : i32
        %true = arith.constant true
        %c0_i32_51 = arith.constant 0 : i32
        %c-1_i32 = arith.constant -1 : i32
        %43 = arith.select %true, %c-1_i32, %c0_i32_51 : i32
        %c-1_i32_52 = arith.constant -1 : i32
        %44 = arith.cmpi eq, %43, %c-1_i32_52 : i32
        %c0_i32_53 = arith.constant 0 : i32
        %45 = arith.select %44, %c0_i32_53, %43 : i32
        %true_54 = arith.constant true
        %c0_i32_55 = arith.constant 0 : i32
        %c1_i32_56 = arith.constant 1 : i32
        %46 = arith.select %true_54, %c1_i32_56, %c0_i32_55 : i32
        %c1_i32_57 = arith.constant 1 : i32
        %47 = arith.cmpi eq, %46, %c1_i32_57 : i32
        %c0_i32_58 = arith.constant 0 : i32
        %48 = arith.select %47, %c0_i32_58, %46 : i32
        %true_59 = arith.constant true
        %c0_i32_60 = arith.constant 0 : i32
        %c1_i32_61 = arith.constant 1 : i32
        %49 = arith.select %true_59, %c1_i32_61, %c0_i32_60 : i32
        %c1_i32_62 = arith.constant 1 : i32
        %50 = arith.cmpi eq, %49, %c1_i32_62 : i32
        %c0_i32_63 = arith.constant 0 : i32
        %51 = arith.select %50, %c0_i32_63, %49 : i32
        "tpu.region"() ({
          %73 = tpu.sem_alloc : memref<!tpu.dma_semaphore, #tpu.memory_space<semaphore_mem>>
          tpu.enqueue_dma source(%arg8 : memref<64x128xbf16, #tpu.memory_space<any>>) target(%alloca : memref<64x128xbf16, #tpu.memory_space<vmem>>) target_semaphore(%73 : memref<!tpu.dma_semaphore, #tpu.memory_space<semaphore_mem>>)
          tpu.wait_dma2 semaphore(%73 : memref<!tpu.dma_semaphore, #tpu.memory_space<semaphore_mem>>) src(%arg8 : memref<64x128xbf16, #tpu.memory_space<any>>) dst(%alloca : memref<64x128xbf16, #tpu.memory_space<vmem>>)
          tpu.yield
        }) : () -> ()
        %c0_i32_64 = arith.constant 0 : i32
        %c0_i32_65 = arith.constant 0 : i32
        %c0_i32_66 = arith.constant 0 : i32
        %c0_i32_67 = arith.constant 0 : i32
        %52 = arith.subi %9, %c0_i32_65 : i32
        %53 = arith.addi %c0_i32_65, %52 : i32
        %c1_i32_68 = arith.constant 1 : i32
        %54:2 = scf.for %arg13 = %c0_i32_65 to %53 step %c1_i32_68 iter_args(%arg14 = %c0_i32_66, %arg15 = %c0_i32_67) -> (i32, i32)  : i32 {
          %c1_i32_93 = arith.constant 1 : i32
          %c1_i32_94 = arith.constant 1 : i32
          %73 = arith.muli %c1_i32_93, %c1_i32_94 : i32
          %c0_i32_95 = arith.constant 0 : i32
          %74 = arith.cmpi eq, %arg13, %c0_i32_95 : i32
          %c1_i32_96 = arith.constant 1 : i32
          %75 = arith.subi %73, %c1_i32_96 : i32
          %76 = arith.cmpi eq, %arg13, %75 : i32
          %true_97 = arith.constant true
          %c0_i32_98 = arith.constant 0 : i32
          %c-1_i32_99 = arith.constant -1 : i32
          %77 = arith.select %true_97, %c-1_i32_99, %c0_i32_98 : i32
          %c-1_i32_100 = arith.constant -1 : i32
          %78 = arith.cmpi eq, %77, %c-1_i32_100 : i32
          %c0_i32_101 = arith.constant 0 : i32
          %79 = arith.select %78, %c0_i32_101, %77 : i32
          %true_102 = arith.constant true
          %c0_i32_103 = arith.constant 0 : i32
          %c1_i32_104 = arith.constant 1 : i32
          %80 = arith.select %true_102, %c1_i32_104, %c0_i32_103 : i32
          %c1_i32_105 = arith.constant 1 : i32
          %81 = arith.cmpi eq, %80, %c1_i32_105 : i32
          %c0_i32_106 = arith.constant 0 : i32
          %82 = arith.select %81, %c0_i32_106, %80 : i32
          %true_107 = arith.constant true
          %c0_i32_108 = arith.constant 0 : i32
          %c1_i32_109 = arith.constant 1 : i32
          %83 = arith.select %true_107, %c1_i32_109, %c0_i32_108 : i32
          %c1_i32_110 = arith.constant 1 : i32
          %84 = arith.cmpi eq, %83, %c1_i32_110 : i32
          %c0_i32_111 = arith.constant 0 : i32
          %85 = arith.select %84, %c0_i32_111, %83 : i32
          "tpu.trace_start"() <{level = 10 : i32, message = "ep_run_kernel"}> : () -> ()
          %c0_112 = arith.constant 0 : index
          %86 = memref.load %arg12[%c0_112] : memref<1xi32, #tpu.memory_space<smem>>
          %c1_i32_113 = arith.constant 1 : i32
          %87 = arith.addi %86, %c1_i32_113 : i32
          %c0_114 = arith.constant 0 : index
          %88 = memref.load %arg12[%c0_114] : memref<1xi32, #tpu.memory_space<smem>>
          memref.store %87, %arg12[%c0_114] : memref<1xi32, #tpu.memory_space<smem>>
          %c0_115 = arith.constant 0 : index
          %c0_116 = arith.constant 0 : index
          %89 = vector.load %alloca[%c0_115, %c0_116] : memref<64x128xbf16, #tpu.memory_space<vmem>>, vector<64x128xbf16>
          %cst_117 = arith.constant dense<0.000000e+00> : vector<64x256xf32>
          %90 = tpu.matmul %89, %6, %cst_117 {dimension_numbers = #tpu.dot_dimension_numbers<[1], [0], [0], [1], [0, 0, 1, 1], [], []>} : vector<64x128xbf16>, vector<128x256xbf16>, vector<64x256xf32> -> vector<64x256xf32>
          %91 = vector.broadcast %8 : vector<1x256xf32> to vector<64x256xf32>
          %92 = arith.addf %90, %91 : vector<64x256xf32>
          %93 = vector.extract_strided_slice %92 {offsets = [0, 0], sizes = [64, 128], strides = [1, 1]} : vector<64x256xf32> to vector<64x128xf32>
          %94 = arith.negf %93 : vector<64x128xf32>
          %95 = math.exp %94 : vector<64x128xf32>
          %cst_118 = arith.constant 1.000000e+00 : f32
          %96 = vector.broadcast %cst_118 : f32 to vector<64x128xf32>
          %97 = arith.addf %96, %95 : vector<64x128xf32>
          %98 = arith.divf %96, %97 : vector<64x128xf32>
          %99 = vector.extract_strided_slice %92 {offsets = [0, 128], sizes = [64, 128], strides = [1, 1]} : vector<64x256xf32> to vector<64x128xf32>
          %100 = tpu.iota {dimensions = array<i32: 0>} : vector<64x128xi32>
          %c64_i32 = arith.constant 64 : i32
          %101 = arith.muli %86, %c64_i32 : i32
          %102 = vector.broadcast %101 : i32 to vector<64x128xi32>
          %103 = arith.addi %100, %102 : vector<64x128xi32>
          %c64_i32_119 = arith.constant 64 : i32
          %104 = vector.broadcast %c64_i32_119 : i32 to vector<64x128xi32>
          %105 = arith.cmpi slt, %103, %104 : vector<64x128xi32>
          %cst_120 = arith.constant 0.000000e+00 : f32
          %106 = vector.broadcast %cst_120 : f32 to vector<64x128xf32>
          %107 = arith.select %105, %98, %106 : vector<64x128xi1>, vector<64x128xf32>
          %cst_121 = arith.constant 0.000000e+00 : f32
          %108 = vector.broadcast %cst_121 : f32 to vector<64x128xf32>
          %109 = arith.select %105, %99, %108 : vector<64x128xi1>, vector<64x128xf32>
          %c0_122 = arith.constant 0 : index
          %c0_123 = arith.constant 0 : index
          %110 = vector.load %arg9[%c0_122, %c0_123] : memref<128x128xf32, #tpu.memory_space<vmem>>, vector<128x128xf32>
          %111 = arith.truncf %107 : vector<64x128xf32> to vector<64x128xbf16>
          %112 = arith.truncf %109 : vector<64x128xf32> to vector<64x128xbf16>
          %cst_124 = arith.constant dense<0.000000e+00> : vector<128x128xf32>
          %113 = tpu.matmul %111, %112, %cst_124 {dimension_numbers = #tpu.dot_dimension_numbers<[0], [0], [1], [1], [0, 1, 1, 1], [], []>} : vector<64x128xbf16>, vector<64x128xbf16>, vector<128x128xf32> -> vector<128x128xf32>
          %114 = arith.addf %110, %113 : vector<128x128xf32>
          %c0_125 = arith.constant 0 : index
          %c0_126 = arith.constant 0 : index
          %115 = vector.load %arg9[%c0_125, %c0_126] : memref<128x128xf32, #tpu.memory_space<vmem>>, vector<128x128xf32>
          tpu.vector_store %arg9[%c0_125, %c0_126], %114 {strides = array<i32>} : memref<128x128xf32, #tpu.memory_space<vmem>>, vector<128x128xf32>,
          %c0_127 = arith.constant 0 : index
          %c0_128 = arith.constant 0 : index
          %116 = vector.load %arg10[%c0_127, %c0_128] : memref<1x128xf32, #tpu.memory_space<vmem>>, vector<1x128xf32>
          %cst_129 = arith.constant dense<0.000000e+00> : vector<128xf32>
          %117 = vector.multi_reduction <add>, %107, %cst_129 [0] : vector<64x128xf32> to vector<128xf32>
          %118 = vector.shape_cast %117 : vector<128xf32> to vector<1x128xf32>
          %119 = arith.addf %116, %118 : vector<1x128xf32>
          %c0_130 = arith.constant 0 : index
          %c0_131 = arith.constant 0 : index
          %120 = vector.load %arg10[%c0_130, %c0_131] : memref<1x128xf32, #tpu.memory_space<vmem>>, vector<1x128xf32>
          tpu.vector_store %arg10[%c0_130, %c0_131], %119 {strides = array<i32>} : memref<1x128xf32, #tpu.memory_space<vmem>>, vector<1x128xf32>,
          "tpu.trace_stop"() : () -> ()
          %false = arith.constant false
          %121 = arith.ori %false, %76 : i1
          %c1_i32_132 = arith.constant 1 : i32
          %122 = arith.addi %arg14, %c1_i32_132 : i32
          %123 = arith.select %121, %122, %arg14 : i32
          %true_133 = arith.constant true
          %c0_i32_134 = arith.constant 0 : i32
          %c1_i32_135 = arith.constant 1 : i32
          %124 = arith.select %true_133, %c1_i32_135, %c0_i32_134 : i32
          %c1_i32_136 = arith.constant 1 : i32
          %125 = arith.cmpi eq, %124, %c1_i32_136 : i32
          %c0_i32_137 = arith.constant 0 : i32
          %126 = arith.select %125, %c0_i32_137, %124 : i32
          %c0_i32_138 = arith.constant 0 : i32
          scf.yield %123, %c0_i32_138 : i32, i32
        }
        %c1_i32_69 = arith.constant 1 : i32
        %55 = arith.subi %54#1, %c1_i32_69 : i32
        %true_70 = arith.constant true
        %56 = arith.select %true_70, %55, %54#1 : i32
        %c-1_i32_71 = arith.constant -1 : i32
        %57 = arith.cmpi eq, %56, %c-1_i32_71 : i32
        %c0_i32_72 = arith.constant 0 : i32
        %58 = arith.select %57, %c0_i32_72, %56 : i32
        %c1_i32_73 = arith.constant 1 : i32
        %59 = arith.subi %9, %c1_i32_73 : i32
        %c1_i32_74 = arith.constant 1 : i32
        %c1_i32_75 = arith.constant 1 : i32
        %60 = arith.muli %c1_i32_74, %c1_i32_75 : i32
        %c0_i32_76 = arith.constant 0 : i32
        %61 = arith.cmpi eq, %59, %c0_i32_76 : i32
        %c1_i32_77 = arith.constant 1 : i32
        %62 = arith.subi %60, %c1_i32_77 : i32
        %63 = arith.cmpi eq, %59, %62 : i32
        %true_78 = arith.constant true
        %c0_i32_79 = arith.constant 0 : i32
        %c-1_i32_80 = arith.constant -1 : i32
        %64 = arith.select %true_78, %c-1_i32_80, %c0_i32_79 : i32
        %c-1_i32_81 = arith.constant -1 : i32
        %65 = arith.cmpi eq, %64, %c-1_i32_81 : i32
        %c0_i32_82 = arith.constant 0 : i32
        %66 = arith.select %65, %c0_i32_82, %64 : i32
        %true_83 = arith.constant true
        %c0_i32_84 = arith.constant 0 : i32
        %c1_i32_85 = arith.constant 1 : i32
        %67 = arith.select %true_83, %c1_i32_85, %c0_i32_84 : i32
        %c1_i32_86 = arith.constant 1 : i32
        %68 = arith.cmpi eq, %67, %c1_i32_86 : i32
        %c0_i32_87 = arith.constant 0 : i32
        %69 = arith.select %68, %c0_i32_87, %67 : i32
        %true_88 = arith.constant true
        %c0_i32_89 = arith.constant 0 : i32
        %c1_i32_90 = arith.constant 1 : i32
        %70 = arith.select %true_88, %c1_i32_90, %c0_i32_89 : i32
        %c1_i32_91 = arith.constant 1 : i32
        %71 = arith.cmpi eq, %70, %c1_i32_91 : i32
        %c0_i32_92 = arith.constant 0 : i32
        %72 = arith.select %71, %c0_i32_92, %70 : i32
      } else {
      }
      tpu.yield
    }) : () -> ()
    %c0_12 = arith.constant 0 : index
    %c0_13 = arith.constant 0 : index
    %10 = vector.load %arg7[%c0_12, %c0_13] : memref<128x128xf32, #tpu.memory_space<vmem>>, vector<128x128xf32>
    %c0_14 = arith.constant 0 : index
    %c0_15 = arith.constant 0 : index
    %11 = vector.load %arg9[%c0_14, %c0_15] : memref<128x128xf32, #tpu.memory_space<vmem>>, vector<128x128xf32>
    %12 = arith.mulf %11, %10 : vector<128x128xf32>
    %13 = arith.truncf %12 : vector<128x128xf32> to vector<128x128xbf16>
    %c0_16 = arith.constant 0 : index
    %c0_17 = arith.constant 0 : index
    %14 = vector.load %arg11[%c0_16, %c0_17] : memref<128x256xbf16, #tpu.memory_space<vmem>>, vector<128x128xbf16>
    tpu.vector_store %arg11[%c0_16, %c0_17], %13 {strides = array<i32>} : memref<128x256xbf16, #tpu.memory_space<vmem>>, vector<128x128xbf16>,
    %c0_18 = arith.constant 0 : index
    %c0_19 = arith.constant 0 : index
    %15 = vector.load %arg10[%c0_18, %c0_19] : memref<1x128xf32, #tpu.memory_space<vmem>>, vector<1x128xf32>
    %16 = vector.broadcast %15 : vector<1x128xf32> to vector<128x128xf32>
    %17 = arith.mulf %10, %16 : vector<128x128xf32>
    %18 = tpu.transpose %17, [1, 0] : vector<128x128xf32> -> vector<128x128xf32>
    %19 = arith.truncf %18 : vector<128x128xf32> to vector<128x128xbf16>
    %c0_20 = arith.constant 0 : index
    %c128 = arith.constant 128 : index
    %20 = vector.load %arg11[%c0_20, %c128] : memref<128x256xbf16, #tpu.memory_space<vmem>>, vector<128x128xbf16>
    tpu.vector_store %arg11[%c0_20, %c128], %19 {strides = array<i32>} : memref<128x256xbf16, #tpu.memory_space<vmem>>, vector<128x128xbf16>,
    %c0_21 = arith.constant 0 : index
    %c0_22 = arith.constant 0 : index
    %21 = vector.load %arg11[%c0_21, %c0_22] : memref<128x256xbf16, #tpu.memory_space<vmem>>, vector<128x256xbf16>
    %c0_23 = arith.constant 0 : index
    %c1 = arith.constant 1 : index
    %c0_24 = arith.constant 0 : index
    %22 = vector.load %arg4[%c0_23, %c1, %c0_24] : memref<1x8x256xf32, #tpu.memory_space<vmem>>, vector<1x1x256xf32>
    %23 = vector.shape_cast %22 : vector<1x1x256xf32> to vector<1x256xf32>
    %c0_25 = arith.constant 0 : index
    %c2 = arith.constant 2 : index
    %c0_26 = arith.constant 0 : index
    %24 = vector.load %arg4[%c0_25, %c2, %c0_26] : memref<1x8x256xf32, #tpu.memory_space<vmem>>, vector<1x1x128xf32>
    %25 = vector.shape_cast %24 : vector<1x1x128xf32> to vector<1x128xf32>
    %c0_27 = arith.constant 0 : index
    %c2_28 = arith.constant 2 : index
    %c128_29 = arith.constant 128 : index
    %26 = vector.load %arg4[%c0_27, %c2_28, %c128_29] : memref<1x8x256xf32, #tpu.memory_space<vmem>>, vector<1x1x128xf32>
    %27 = vector.shape_cast %26 : vector<1x1x128xf32> to vector<1x128xf32>
    %c0_30 = arith.constant 0 : index
    %c3 = arith.constant 3 : index
    %c0_31 = arith.constant 0 : index
    %28 = vector.load %arg4[%c0_30, %c3, %c0_31] : memref<1x8x256xf32, #tpu.memory_space<vmem>>, vector<1x1x128xf32>
    %29 = vector.shape_cast %28 : vector<1x1x128xf32> to vector<1x128xf32>
    %c0_32 = arith.constant 0 : index
    %c0_33 = arith.constant 0 : index
    %30 = vector.load %arg6[%c0_32, %c0_33] : memref<8x128xf32, #tpu.memory_space<vmem>>, vector<1x128xf32>
    %c1_34 = arith.constant 1 : index
    %c0_35 = arith.constant 0 : index
    %31 = vector.load %arg6[%c1_34, %c0_35] : memref<8x128xf32, #tpu.memory_space<vmem>>, vector<1x128xf32>
    %c2_36 = arith.constant 2 : index
    %c0_37 = arith.constant 0 : index
    %32 = vector.load %arg6[%c2_36, %c0_37] : memref<8x128xf32, #tpu.memory_space<vmem>>, vector<1x128xf32>
    %c0_38 = arith.constant 0 : index
    %c0_39 = arith.constant 0 : index
    %c0_40 = arith.constant 0 : index
    %33 = vector.load %arg3[%c0_38, %c0_39, %c0_40] : memref<1x128x256xbf16, #tpu.memory_space<vmem>>, vector<1x128x256xbf16>
    %34 = vector.shape_cast %33 : vector<1x128x256xbf16> to vector<128x256xbf16>
    %c0_41 = arith.constant 0 : index
    %c0_42 = arith.constant 0 : index
    %35 = vector.load %arg5[%c0_41, %c0_42] : memref<128x128xbf16, #tpu.memory_space<vmem>>, vector<128x128xbf16>
    %c1_i32_43 = arith.constant 1 : i32
    %c1_i32_44 = arith.constant 1 : i32
    %36 = arith.muli %c1_i32_43, %c1_i32_44 : i32
    "tpu.region"() ({
      %alloca = memref.alloca() : memref<64x128xbf16, #tpu.memory_space<vmem>>
      %alloca_45 = memref.alloca() : memref<64x128xbf16, #tpu.memory_space<vmem>>
      %c0_i32_46 = arith.constant 0 : i32
      %37 = arith.cmpi sgt, %36, %c0_i32_46 : i32
      %38 = arith.extui %37 : i1 to i32
      %c0_i32_47 = arith.constant 0 : i32
      %39 = arith.cmpi ne, %38, %c0_i32_47 : i32
      scf.if %39 {
        %c1_i32_48 = arith.constant 1 : i32
        %c1_i32_49 = arith.constant 1 : i32
        %40 = arith.muli %c1_i32_48, %c1_i32_49 : i32
        %c1_i32_50 = arith.constant 1 : i32
        %41 = arith.subi %40, %c1_i32_50 : i32
        %c0_i32_51 = arith.constant 0 : i32
        %42 = arith.cmpi eq, %41, %c0_i32_51 : i32
        %true = arith.constant true
        %c0_i32_52 = arith.constant 0 : i32
        %c-1_i32 = arith.constant -1 : i32
        %43 = arith.select %true, %c-1_i32, %c0_i32_52 : i32
        %c-1_i32_53 = arith.constant -1 : i32
        %44 = arith.cmpi eq, %43, %c-1_i32_53 : i32
        %c0_i32_54 = arith.constant 0 : i32
        %45 = arith.select %44, %c0_i32_54, %43 : i32
        %true_55 = arith.constant true
        %c0_i32_56 = arith.constant 0 : i32
        %c1_i32_57 = arith.constant 1 : i32
        %46 = arith.select %true_55, %c1_i32_57, %c0_i32_56 : i32
        %c1_i32_58 = arith.constant 1 : i32
        %47 = arith.cmpi eq, %46, %c1_i32_58 : i32
        %c0_i32_59 = arith.constant 0 : i32
        %48 = arith.select %47, %c0_i32_59, %46 : i32
        %true_60 = arith.constant true
        %c0_i32_61 = arith.constant 0 : i32
        %c1_i32_62 = arith.constant 1 : i32
        %49 = arith.select %true_60, %c1_i32_62, %c0_i32_61 : i32
        %c1_i32_63 = arith.constant 1 : i32
        %50 = arith.cmpi eq, %49, %c1_i32_63 : i32
        %c0_i32_64 = arith.constant 0 : i32
        %51 = arith.select %50, %c0_i32_64, %49 : i32
        "tpu.region"() ({
          %73 = tpu.sem_alloc : memref<!tpu.dma_semaphore, #tpu.memory_space<semaphore_mem>>
          tpu.enqueue_dma source(%arg8 : memref<64x128xbf16, #tpu.memory_space<any>>) target(%alloca : memref<64x128xbf16, #tpu.memory_space<vmem>>) target_semaphore(%73 : memref<!tpu.dma_semaphore, #tpu.memory_space<semaphore_mem>>)
          tpu.wait_dma2 semaphore(%73 : memref<!tpu.dma_semaphore, #tpu.memory_space<semaphore_mem>>) src(%arg8 : memref<64x128xbf16, #tpu.memory_space<any>>) dst(%alloca : memref<64x128xbf16, #tpu.memory_space<vmem>>)
          tpu.yield
        }) : () -> ()
        %c0_i32_65 = arith.constant 0 : i32
        %c0_i32_66 = arith.constant 0 : i32
        %c0_i32_67 = arith.constant 0 : i32
        %c0_i32_68 = arith.constant 0 : i32
        %c0_i32_69 = arith.constant 0 : i32
        %c0_i32_70 = arith.constant 0 : i32
        %52 = arith.subi %36, %c0_i32_68 : i32
        %53 = arith.addi %c0_i32_68, %52 : i32
        %c1_i32_71 = arith.constant 1 : i32
        %54:2 = scf.for %arg13 = %c0_i32_68 to %53 step %c1_i32_71 iter_args(%arg14 = %c0_i32_69, %arg15 = %c0_i32_70) -> (i32, i32)  : i32 {
          %c1_i32_96 = arith.constant 1 : i32
          %c1_i32_97 = arith.constant 1 : i32
          %73 = arith.muli %c1_i32_96, %c1_i32_97 : i32
          %c0_i32_98 = arith.constant 0 : i32
          %74 = arith.cmpi eq, %arg13, %c0_i32_98 : i32
          %c1_i32_99 = arith.constant 1 : i32
          %75 = arith.subi %73, %c1_i32_99 : i32
          %76 = arith.cmpi eq, %arg13, %75 : i32
          %true_100 = arith.constant true
          %c0_i32_101 = arith.constant 0 : i32
          %c-1_i32_102 = arith.constant -1 : i32
          %77 = arith.select %true_100, %c-1_i32_102, %c0_i32_101 : i32
          %c-1_i32_103 = arith.constant -1 : i32
          %78 = arith.cmpi eq, %77, %c-1_i32_103 : i32
          %c0_i32_104 = arith.constant 0 : i32
          %79 = arith.select %78, %c0_i32_104, %77 : i32
          %true_105 = arith.constant true
          %c0_i32_106 = arith.constant 0 : i32
          %c1_i32_107 = arith.constant 1 : i32
          %80 = arith.select %true_105, %c1_i32_107, %c0_i32_106 : i32
          %c1_i32_108 = arith.constant 1 : i32
          %81 = arith.cmpi eq, %80, %c1_i32_108 : i32
          %c0_i32_109 = arith.constant 0 : i32
          %82 = arith.select %81, %c0_i32_109, %80 : i32
          %true_110 = arith.constant true
          %c0_i32_111 = arith.constant 0 : i32
          %c1_i32_112 = arith.constant 1 : i32
          %83 = arith.select %true_110, %c1_i32_112, %c0_i32_111 : i32
          %c1_i32_113 = arith.constant 1 : i32
          %84 = arith.cmpi eq, %83, %c1_i32_113 : i32
          %c0_i32_114 = arith.constant 0 : i32
          %85 = arith.select %84, %c0_i32_114, %83 : i32
          "tpu.trace_start"() <{level = 10 : i32, message = "ep_run_kernel"}> : () -> ()
          %c0_115 = arith.constant 0 : index
          %c0_116 = arith.constant 0 : index
          %86 = vector.load %alloca[%c0_115, %c0_116] : memref<64x128xbf16, #tpu.memory_space<vmem>>, vector<64x128xbf16>
          %cst_117 = arith.constant dense<0.000000e+00> : vector<64x256xf32>
          %87 = tpu.matmul %86, %34, %cst_117 {dimension_numbers = #tpu.dot_dimension_numbers<[1], [0], [0], [1], [0, 0, 1, 1], [], []>} : vector<64x128xbf16>, vector<128x256xbf16>, vector<64x256xf32> -> vector<64x256xf32>
          %88 = vector.broadcast %23 : vector<1x256xf32> to vector<64x256xf32>
          %89 = arith.addf %87, %88 : vector<64x256xf32>
          %90 = vector.extract_strided_slice %89 {offsets = [0, 0], sizes = [64, 128], strides = [1, 1]} : vector<64x256xf32> to vector<64x128xf32>
          %91 = vector.extract_strided_slice %89 {offsets = [0, 128], sizes = [64, 128], strides = [1, 1]} : vector<64x256xf32> to vector<64x128xf32>
          %92 = arith.negf %91 : vector<64x128xf32>
          %93 = math.exp %92 : vector<64x128xf32>
          %cst_118 = arith.constant 1.000000e+00 : f32
          %94 = vector.broadcast %cst_118 : f32 to vector<64x128xf32>
          %95 = arith.addf %94, %93 : vector<64x128xf32>
          %96 = arith.divf %94, %95 : vector<64x128xf32>
          %97 = arith.truncf %96 : vector<64x128xf32> to vector<64x128xbf16>
          %cst_119 = arith.constant dense<0.000000e+00> : vector<64x256xf32>
          %98 = tpu.matmul %97, %21, %cst_119 {dimension_numbers = #tpu.dot_dimension_numbers<[1], [0], [0], [1], [0, 0, 1, 1], [], []>} : vector<64x128xbf16>, vector<128x256xbf16>, vector<64x256xf32> -> vector<64x256xf32>
          %99 = vector.extract_strided_slice %98 {offsets = [0, 0], sizes = [64, 128], strides = [1, 1]} : vector<64x256xf32> to vector<64x128xf32>
          %100 = vector.extract_strided_slice %98 {offsets = [0, 128], sizes = [64, 128], strides = [1, 1]} : vector<64x256xf32> to vector<64x128xf32>
          %101 = vector.broadcast %31 : vector<1x128xf32> to vector<64x128xf32>
          %102 = arith.addf %100, %101 : vector<64x128xf32>
          %103 = tpu.reciprocal %102 {approx = true} : vector<64x128xf32> -> vector<64x128xf32>
          %104 = arith.mulf %99, %103 : vector<64x128xf32>
          %cst_120 = arith.constant dense<0.000000e+00> : vector<64xf32>
          %105 = vector.multi_reduction <add>, %104, %cst_120 [1] : vector<64x128xf32> to vector<64xf32>
          %106 = vector.shape_cast %105 : vector<64xf32> to vector<64x1xf32>
          %cst_121 = arith.constant 1.562500e-02 : f32
          %107 = vector.broadcast %cst_121 : f32 to vector<64x1xf32>
          %108 = arith.mulf %106, %107 : vector<64x1xf32>
          %109 = vector.broadcast %108 : vector<64x1xf32> to vector<64x128xf32>
          %110 = arith.subf %104, %109 : vector<64x128xf32>
          %111 = vector.broadcast %32 : vector<1x128xf32> to vector<64x128xf32>
          %112 = arith.mulf %110, %111 : vector<64x128xf32>
          %113 = arith.mulf %112, %112 : vector<64x128xf32>
          %cst_122 = arith.constant dense<0.000000e+00> : vector<64xf32>
          %114 = vector.multi_reduction <add>, %113, %cst_122 [1] : vector<64x128xf32> to vector<64xf32>
          %115 = vector.shape_cast %114 : vector<64xf32> to vector<64x1xf32>
          %cst_123 = arith.constant 1.562500e-02 : f32
          %116 = vector.broadcast %cst_123 : f32 to vector<64x1xf32>
          %117 = arith.mulf %115, %116 : vector<64x1xf32>
          %cst_124 = arith.constant 9.99999974E-6 : f32
          %118 = vector.broadcast %cst_124 : f32 to vector<64x1xf32>
          %119 = arith.addf %117, %118 : vector<64x1xf32>
          %120 = math.rsqrt %119 : vector<64x1xf32>
          %121 = vector.broadcast %120 : vector<64x1xf32> to vector<64x128xf32>
          %122 = arith.mulf %112, %121 : vector<64x128xf32>
          %123 = vector.broadcast %25 : vector<1x128xf32> to vector<64x128xf32>
          %124 = arith.mulf %122, %123 : vector<64x128xf32>
          %125 = vector.broadcast %27 : vector<1x128xf32> to vector<64x128xf32>
          %126 = arith.addf %124, %125 : vector<64x128xf32>
          %127 = vector.broadcast %29 : vector<1x128xf32> to vector<64x128xf32>
          %128 = arith.addf %90, %127 : vector<64x128xf32>
          %129 = arith.mulf %126, %128 : vector<64x128xf32>
          %130 = arith.truncf %129 : vector<64x128xf32> to vector<64x128xbf16>
          %cst_125 = arith.constant dense<0.000000e+00> : vector<64x128xf32>
          %131 = tpu.matmul %130, %35, %cst_125 {dimension_numbers = #tpu.dot_dimension_numbers<[1], [0], [0], [1], [0, 0, 1, 1], [], []>} : vector<64x128xbf16>, vector<128x128xbf16>, vector<64x128xf32> -> vector<64x128xf32>
          %132 = vector.broadcast %30 : vector<1x128xf32> to vector<64x128xf32>
          %133 = arith.addf %131, %132 : vector<64x128xf32>
          %cst_126 = arith.constant 0.000000e+00 : f32
          %134 = vector.broadcast %cst_126 : f32 to vector<64x128xf32>
          %135 = arith.maximumf %133, %134 : vector<64x128xf32>
          %136 = arith.truncf %135 : vector<64x128xf32> to vector<64x128xbf16>
          %c0_127 = arith.constant 0 : index
          %c0_128 = arith.constant 0 : index
          %137 = vector.load %alloca_45[%c0_127, %c0_128] : memref<64x128xbf16, #tpu.memory_space<vmem>>, vector<64x128xbf16>
          tpu.vector_store %alloca_45[%c0_127, %c0_128], %136 {strides = array<i32>} : memref<64x128xbf16, #tpu.memory_space<vmem>>, vector<64x128xbf16>,
          "tpu.trace_stop"() : () -> ()
          %false = arith.constant false
          %138 = arith.ori %false, %76 : i1
          %c1_i32_129 = arith.constant 1 : i32
          %139 = arith.addi %arg14, %c1_i32_129 : i32
          %140 = arith.select %138, %139, %arg14 : i32
          %true_130 = arith.constant true
          %c0_i32_131 = arith.constant 0 : i32
          %c1_i32_132 = arith.constant 1 : i32
          %141 = arith.select %true_130, %c1_i32_132, %c0_i32_131 : i32
          %c1_i32_133 = arith.constant 1 : i32
          %142 = arith.cmpi eq, %141, %c1_i32_133 : i32
          %c0_i32_134 = arith.constant 0 : i32
          %143 = arith.select %142, %c0_i32_134, %141 : i32
          %c0_i32_135 = arith.constant 0 : i32
          scf.yield %140, %c0_i32_135 : i32, i32
        }
        %c1_i32_72 = arith.constant 1 : i32
        %55 = arith.subi %54#1, %c1_i32_72 : i32
        %true_73 = arith.constant true
        %56 = arith.select %true_73, %55, %54#1 : i32
        %c-1_i32_74 = arith.constant -1 : i32
        %57 = arith.cmpi eq, %56, %c-1_i32_74 : i32
        %c0_i32_75 = arith.constant 0 : i32
        %58 = arith.select %57, %c0_i32_75, %56 : i32
        %c1_i32_76 = arith.constant 1 : i32
        %59 = arith.subi %36, %c1_i32_76 : i32
        %c1_i32_77 = arith.constant 1 : i32
        %c1_i32_78 = arith.constant 1 : i32
        %60 = arith.muli %c1_i32_77, %c1_i32_78 : i32
        %c0_i32_79 = arith.constant 0 : i32
        %61 = arith.cmpi eq, %59, %c0_i32_79 : i32
        %c1_i32_80 = arith.constant 1 : i32
        %62 = arith.subi %60, %c1_i32_80 : i32
        %63 = arith.cmpi eq, %59, %62 : i32
        %true_81 = arith.constant true
        %c0_i32_82 = arith.constant 0 : i32
        %c-1_i32_83 = arith.constant -1 : i32
        %64 = arith.select %true_81, %c-1_i32_83, %c0_i32_82 : i32
        %c-1_i32_84 = arith.constant -1 : i32
        %65 = arith.cmpi eq, %64, %c-1_i32_84 : i32
        %c0_i32_85 = arith.constant 0 : i32
        %66 = arith.select %65, %c0_i32_85, %64 : i32
        %true_86 = arith.constant true
        %c0_i32_87 = arith.constant 0 : i32
        %c1_i32_88 = arith.constant 1 : i32
        %67 = arith.select %true_86, %c1_i32_88, %c0_i32_87 : i32
        %c1_i32_89 = arith.constant 1 : i32
        %68 = arith.cmpi eq, %67, %c1_i32_89 : i32
        %c0_i32_90 = arith.constant 0 : i32
        %69 = arith.select %68, %c0_i32_90, %67 : i32
        %true_91 = arith.constant true
        %c0_i32_92 = arith.constant 0 : i32
        %c1_i32_93 = arith.constant 1 : i32
        %70 = arith.select %true_91, %c1_i32_93, %c0_i32_92 : i32
        %c1_i32_94 = arith.constant 1 : i32
        %71 = arith.cmpi eq, %70, %c1_i32_94 : i32
        %c0_i32_95 = arith.constant 0 : i32
        %72 = arith.select %71, %c0_i32_95, %70 : i32
        "tpu.region"() ({
          %73 = tpu.sem_alloc : memref<!tpu.dma_semaphore, #tpu.memory_space<semaphore_mem>>
          tpu.enqueue_dma source(%alloca_45 : memref<64x128xbf16, #tpu.memory_space<vmem>>) target(%arg8 : memref<64x128xbf16, #tpu.memory_space<any>>) target_semaphore(%73 : memref<!tpu.dma_semaphore, #tpu.memory_space<semaphore_mem>>)
          tpu.wait_dma2 semaphore(%73 : memref<!tpu.dma_semaphore, #tpu.memory_space<semaphore_mem>>) src(%alloca_45 : memref<64x128xbf16, #tpu.memory_space<vmem>>) dst(%arg8 : memref<64x128xbf16, #tpu.memory_space<any>>)
          tpu.yield
        }) : () -> ()
      } else {
      }
      tpu.yield
    }) : () -> ()
    return
  }
  func.func @transform_1(%arg0: i32) -> (i32, i32, i32) {
    %c0_i32 = arith.constant 0 : i32
    %c0_i32_0 = arith.constant 0 : i32
    %c0_i32_1 = arith.constant 0 : i32
    return %arg0, %c0_i32, %c0_i32_0 : i32, i32, i32
  }
  func.func @transform_2(%arg0: i32) -> (i32, i32, i32) {
    %c0_i32 = arith.constant 0 : i32
    %c0_i32_0 = arith.constant 0 : i32
    %c0_i32_1 = arith.constant 0 : i32
    return %arg0, %c0_i32, %c0_i32_0 : i32, i32, i32
  }
  func.func @transform_3(%arg0: i32) -> (i32, i32, i32) {
    %c0_i32 = arith.constant 0 : i32
    %c0_i32_0 = arith.constant 0 : i32
    %c0_i32_1 = arith.constant 0 : i32
    return %arg0, %c0_i32, %c0_i32_0 : i32, i32, i32
  }
  func.func @transform_4(%arg0: i32) -> (i32, i32) {
    %c0_i32 = arith.constant 0 : i32
    %c0_i32_0 = arith.constant 0 : i32
    %c0_i32_1 = arith.constant 0 : i32
    return %c0_i32, %c0_i32_0 : i32, i32
  }
  func.func @transform_5(%arg0: i32) -> (i32, i32) {
    %c0_i32 = arith.constant 0 : i32
    %c0_i32_0 = arith.constant 0 : i32
    %c0_i32_1 = arith.constant 0 : i32
    return %c0_i32, %c0_i32_0 : i32, i32
  }
  func.func @transform_6(%arg0: i32) -> (i32, i32) {
    %c0_i32 = arith.constant 0 : i32
    %c0_i32_0 = arith.constant 0 : i32
    %c0_i32_1 = arith.constant 0 : i32
    return %c0_i32, %c0_i32_0 : i32, i32
  }
}

</mosaic_0001>

<bundles_post_ra>
// kernel: global_attn_pallas.1
= control target key start
LH: loop header
LB: loop body
LE: loop exit
PB: predicated region body
PF: predicated region fallthrough
CT: control target
= control target key end

     0   :  { %s2054_s23 = smov 0   ;;  %s2637_s0 = inlined_call_operand.vmem [shape: bf16[64,128], index: 0, kind: input, shape index: {}, may-alias: {0,7}]   ;;  %s2638_s1 = inlined_call_operand.vmem [shape: bf16[2,128,256], index: 1, kind: input, shape index: {}]   ;;  %s2639_s2 = inlined_call_operand.vmem [shape: bf16[2,128,256], index: 2, kind: input, shape index: {}]   ;;  %s2640_s3 = inlined_call_operand.vmem [shape: f32[2,8,256], index: 3, kind: input, shape index: {}]   ;;  %s2641_s4 = inlined_call_operand.vmem [shape: bf16[128,128], index: 4, kind: input, shape index: {}]   ;;  %s2642_s5 = inlined_call_operand.vmem [shape: f32[8,128], index: 5, kind: input, shape index: {}]   ;;  %s2643_s6 = inlined_call_operand.vmem [shape: f32[128,128], index: 6, kind: input, shape index: {}]   ;;  %s2644_s7 = inlined_call_operand.vmem [shape: bf16[64,128], index: 7, kind: output, shape index: {}, may-alias: {0,7}]  }
   0x1 LB: > { %s1719_s24 = sadd.s32 4294967295, %s2008_s23   ;;  %p1724_p0 = scmp.lt.s32.totalorder %s2008_s23, 1  ;;  %s2008_s23 = sphi %s2054_s23, %s17_s23  }
   0x3   : > { %164 = sbr.rel (%p1724_p0) target bundleno = 1889 (0x761), region = 44 }
   0xa   : > { %p193_p1 = scmp.lt.s32.totalorder %s1719_s24, 1  ;;  %v2010_v0 = vmov 0.0  }
   0xb   : > { %225 = vst [vmem:[#allocation3] sm:$0x1] %v2010_v0 }
   0xc   : > { %s2689_s24 = smov (!%p193_p1, %s1719_s24), 1 }
   0xd   : > { %s1813_s25 = sshll.u32 %s2689_s24, 7  ;;  %s1815_s26 = sshll.u32 %s2689_s24, 4 }
   0xe   : > { %s197_s29 = scalar_lea.vmem %s2638_s1, %s1813_s25  ;;  %s2067_s9 = scalar_lea.vmem %s2639_s2, %s1813_s25 }
   0xf   : > { %v228_v1 = vld [vmem:[%s197_s29] sm:$0xff]  ;;  %v229_v2 = vld [vmem:[%s197_s29 + $0x8] sm:$0xff]  ;;  %v230_v3 = vld [vmem:[%s197_s29 + $0x10] sm:$0xff]  ;;  %s2072_s12 = scalar_lea.vmem %s2640_s3, %s1815_s26 }
  0x10   : > { %v231_v4 = vld [vmem:[%s197_s29 + $0x18] sm:$0xff]  ;;  %v232_v5 = vld [vmem:[%s197_s29 + $0x20] sm:$0xff]  ;;  %v233_v6 = vld [vmem:[%s197_s29 + $0x28] sm:$0xff] }
  0x11   : > { %v234_v7 = vld [vmem:[%s197_s29 + $0x30] sm:$0xff]  ;;  %v235_v8 = vld [vmem:[%s197_s29 + $0x38] sm:$0xff]  ;;  %v236_v9 = vld [vmem:[%s197_s29 + $0x40] sm:$0xff] }
  0x12   : > { %v237_v10 = vld [vmem:[%s197_s29 + $0x48] sm:$0xff]  ;;  %v238_v11 = vld [vmem:[%s197_s29 + $0x50] sm:$0xff]  ;;  %v239_v12 = vld [vmem:[%s197_s29 + $0x58] sm:$0xff] }
  0x13   : > { %v240_v13 = vld [vmem:[%s197_s29 + $0x60] sm:$0xff]  ;;  %v241_v14 = vld [vmem:[%s197_s29 + $0x68] sm:$0xff]  ;;  %v242_v15 = vld [vmem:[%s197_s29 + $0x70] sm:$0xff] }
  0x14   : > { %v243_v16 = vld [vmem:[%s197_s29 + $0x78] sm:$0xff]  ;;  %v244_v17 = vld [vmem:[%s2072_s12] ss:$8 sm:$0x3] }
  0x15   : > { %v277_v18 = vld [vmem:[%s2644_s7] sm:$0xff]  ;;  %v279_v19 = vld [vmem:[%s2644_s7 + $0x8] sm:$0xff]  ;;  %v281_v20 = vld [vmem:[%s2644_s7 + $0x10] sm:$0xff] }
  0x16   : > { %v283_v21 = vld [vmem:[%s2644_s7 + $0x18] sm:$0xff] }
  0x17   : > { %292 = vsyncadd [#allocation7], 512 }
  0x18   : > { %2000 = dma.done.wait [#allocation7], 512 }
  0x19   : > { %2001 = vsyncadd [#allocation7], 4294966784  ;;  %v1732_v22 = vcombine.high %v228_v1, %v229_v2  ;;  %v1731_v23 = vcombine.low %v228_v1, %v229_v2  ;;  %v1734_v24 = vcombine.high %v230_v3, %v231_v4  ;;  %v1733_v25 = vcombine.low %v230_v3, %v231_v4 }
  0x1a   : > { %v1736_v26 = vcombine.high %v232_v5, %v233_v6  ;;  %v2011_v27 = vmov 0   ;;  %v1735_v28 = vcombine.low %v232_v5, %v233_v6  ;;  %v1738_v29 = vcombine.high %v234_v7, %v235_v8 }
  0x1b   : > { %395 = vmatprep.subr.bf16.mxu0 %v1732_v22  ;;  %427 = vmatprep.mubr.bf16.mxu0 %v2011_v27  ;;  %v1737_v30 = vcombine.low %v234_v7, %v235_v8  ;;  %v1740_v31 = vcombine.high %v236_v9, %v237_v10  ;;  %v1739_v32 = vcombine.low %v236_v9, %v237_v10  ;;  %v305_v39 = vlaneseq }
  0x1c   : > { %396 = vmatpush1.bf16.msra.mxu0 %v1731_v23  ;;  %v1742_v33 = vcombine.high %v238_v11, %v239_v12  ;;  %v1741_v34 = vcombine.low %v238_v11, %v239_v12  ;;  %v1744_v35 = vcombine.high %v240_v13, %v241_v14  ;;  %v1743_v36 = vcombine.low %v240_v13, %v241_v14 }
  0x1d   : > { %397 = vmatprep.subr.bf16.mxu0 %v1734_v24  ;;  %v1746_v37 = vcombine.high %v242_v15, %v243_v16  ;;  %v1745_v38 = vcombine.low %v242_v15, %v243_v16  ;;  %v2087_v40 = vshrl.u32 %v305_v39, 7  ;;  %vm2012_vm0 = vmmov 1  }
  0x1e   : > { %vm2103_vm1 = vmpackc.low %vm2012_vm0, %vm2012_vm0  ;;  %vm599_vm2 = vcmask 523264  }
  0x1f   : > { %v2645_v41 = vsub.s32 0, %v2087_v40  ;;  %v2646_v42 = vsub.s32 1, %v2087_v40 }
  0x20   : > { %398 = vmatpush1.bf16.msra.mxu0 %v1733_v25 }
  0x21   : > { %399 = vmatprep.subr.bf16.mxu0 %v1736_v26  ;;  %v2093_v43 = vrot.slane %v244_v17, %v2645_v41  ;;  %v2097_v45 = vrot.slane %v244_v17, %v2646_v42  ;;  %v2405_v41 = vld [vmem:[%s2641_s4 + $0x3c] sm:$0xf] }
  0x22   : > { %2664 = vst [vmem:[#allocation30_spill] sm:$0xff] %v2405_v41 }
  0x24   : > { %400 = vmatpush1.bf16.msra.mxu0 %v1735_v28 }
  0x25   : > { %401 = vmatprep.subr.bf16.mxu0 %v1738_v29 }
  0x28   : > { %402 = vmatpush1.bf16.msra.mxu0 %v1737_v30 }
  0x29   : > { %403 = vmatprep.subr.bf16.mxu0 %v1740_v31 }
  0x2c   : > { %404 = vmatpush1.bf16.msra.mxu0 %v1739_v32 }
  0x2d   : > { %405 = vmatprep.subr.bf16.mxu0 %v1742_v33 }
  0x30   : > { %406 = vmatpush1.bf16.msra.mxu0 %v1741_v34 }
  0x31   : > { %407 = vmatprep.subr.bf16.mxu0 %v1744_v35 }
  0x34   : > { %408 = vmatpush1.bf16.msra.mxu0 %v1743_v36 }
  0x35   : > { %409 = vmatprep.subr.bf16.mxu0 %v1746_v37 }
  0x38   : > { %410 = vmatpush1.bf16.msra.mxu0 %v1745_v38 }
  0x3b   : > { %428 = vmatmul.mubr.bf16.vlgmr.msra.gmra.mrb[0].mxu0 %v277_v18 }
  0x3c   : > { %437 = vmatprep.mubr.bf16.mxu0 %v2011_v27 }
  0x43   : > { %438 = vmatmul.mubr.bf16.gmra.mrb[4].mxu0 %v279_v19 }
  0x44   : > { %447 = vmatprep.mubr.bf16.mxu0 %v2011_v27 }
  0x4b   : > { %448 = vmatmul.mubr.bf16.gmra.mrb[8].mxu0 %v281_v20 }
  0x4c   : > { %457 = vmatprep.mubr.bf16.mxu0 %v2011_v27 }
  0x53   : > { %458 = vmatmul.mubr.bf16.gmra.mrb[12].mxu0 %v283_v21 }
 0x10e   : > { %v429_v44 = vpop.f32.mrb[0].mxu0 }
 0x10f   : > { %v430_v46 = vadd.f32 %v429_v44, %v2093_v43  ;;  %v431_v47 = vpop.f32.mrb[1].mxu0 }
 0x110   : > { %v433_v48 = vpop.f32.mrb[2].mxu0  ;;  %v432_v52 = vadd.f32 %v431_v47, %v2097_v45 }
 0x111   : > { %v1747_v49 = vmul.f32 -1.442695, %v430_v46  ;;  %v434_v50 = vadd.f32 %v433_v48, %v2093_v43  ;;  %v435_v51 = vpop.f32.mrb[3].mxu0 }
 0x112   : > { %v436_v53 = vadd.f32 %v435_v51, %v2097_v45 }
 0x113   : > { %1900 = vpow2.f32 %v1747_v49  ;;  %v1748_v54 = vmul.f32 -1.442695, %v434_v50 }
 0x114   : > { %v1757_v56 = vpack.c.bf16 %v436_v53, %v432_v52 }
 0x115   : > { %1902 = vpow2.f32 %v1748_v54 }
 0x116   : > { %v439_v57 = vpop.f32.mrb[4].mxu0  ;;  %1840 = vmatprep.subr.msk.bf16.mxu1 %vm2103_vm1, %v1757_v56 }
 0x117   : > { %v440_v58 = vadd.f32 %v439_v57, %v2093_v43  ;;  %v441_v59 = vpop.f32.mrb[5].mxu0  ;;  %1841 = vmatpush3.bf16.msk.msra.mxu1 %vm2103_vm1, %v1757_v56 }
 0x118   : > { %v443_v60 = vpop.f32.mrb[6].mxu0  ;;  %v442_v0 = vadd.f32 %v441_v59, %v2097_v45 }
 0x119   : > { %v1749_v61 = vmul.f32 -1.442695, %v440_v58  ;;  %v444_v62 = vadd.f32 %v443_v60, %v2093_v43  ;;  %v445_v63 = vpop.f32.mrb[7].mxu0 }
 0x11a   : > { %v446_v1 = vadd.f32 %v445_v63, %v2097_v45 }
 0x11b   : > { %1904 = vpow2.f32 %v1749_v61  ;;  %v1750_v2 = vmul.f32 -1.442695, %v444_v62 }
 0x11c   : > { %v1760_v3 = vpack.c.bf16 %v446_v1, %v442_v0 }
 0x11d   : > { %v1901_v4 = vpop.eup %1900  ;;  %1906 = vpow2.f32 %v1750_v2 }
 0x11e   : > { %v492_v5 = vadd.f32 1.0, %v1901_v4  ;;  %v449_v6 = vpop.f32.mrb[8].mxu0  ;;  %1842 = vmatprep.subr.msk.bf16.mxu1 %vm2103_vm1, %v1760_v3 }
 0x11f   : > { %v1903_v7 = vpop.eup %1902  ;;  %v450_v8 = vadd.f32 %v449_v6, %v2093_v43  ;;  %v451_v9 = vpop.f32.mrb[9].mxu0  ;;  %1843 = vmatpush3.bf16.msk.msra.mxu1 %vm2103_vm1, %v1760_v3 }
 0x120   : > { %v493_v10 = vadd.f32 1.0, %v1903_v7  ;;  %v453_v11 = vpop.f32.mrb[10].mxu0  ;;  %1908 = vrcp.f32 %v492_v5  ;;  %v452_v15 = vadd.f32 %v451_v9, %v2097_v45  ;;  %v753_v5 = vld [vmem:[#allocation3] sm:$0x1] }
 0x121   : > { %v1751_v12 = vmul.f32 -1.442695, %v450_v8  ;;  %v454_v13 = vadd.f32 %v453_v11, %v2093_v43  ;;  %v455_v14 = vpop.f32.mrb[11].mxu0 }
 0x122   : > { %1910 = vrcp.f32 %v493_v10  ;;  %v456_v16 = vadd.f32 %v455_v14, %v2097_v45 }
 0x123   : > { %1912 = vpow2.f32 %v1751_v12  ;;  %v1752_v17 = vmul.f32 -1.442695, %v454_v13 }
 0x124   : > { %v1763_v18 = vpack.c.bf16 %v456_v16, %v452_v15 }
 0x125   : > { %v1905_v19 = vpop.eup %1904  ;;  %1914 = vpow2.f32 %v1752_v17 }
 0x126   : > { %v494_v20 = vadd.f32 1.0, %v1905_v19  ;;  %v459_v21 = vpop.f32.mrb[12].mxu0  ;;  %1844 = vmatprep.subr.msk.bf16.mxu1 %vm2103_vm1, %v1763_v18 }
 0x127   : > { %v1907_v22 = vpop.eup %1906  ;;  %v460_v23 = vadd.f32 %v459_v21, %v2093_v43  ;;  %v461_v24 = vpop.f32.mrb[13].mxu0  ;;  %1845 = vmatpush3.bf16.msk.msra.mxu1 %vm2103_vm1, %v1763_v18 }
 0x128   : > { %1916 = vrcp.f32 %v494_v20  ;;  %v495_v25 = vadd.f32 1.0, %v1907_v22  ;;  %v463_v26 = vpop.f32.mrb[14].mxu0  ;;  %v462_v30 = vadd.f32 %v461_v24, %v2097_v45 }
 0x129   : > { %v1753_v27 = vmul.f32 -1.442695, %v460_v23  ;;  %v464_v28 = vadd.f32 %v463_v26, %v2093_v43  ;;  %v465_v29 = vpop.f32.mrb[15].mxu0 }
 0x12a   : > { %1918 = vrcp.f32 %v495_v25  ;;  %v466_v31 = vadd.f32 %v465_v29, %v2097_v45  ;;  %v1909_v32 = vpop.eup %1908 }
 0x12b   : > { %1920 = vpow2.f32 %v1753_v27  ;;  %v1754_v33 = vmul.f32 -1.442695, %v464_v28 }
 0x12c   : > { %v1911_v34 = vpop.eup %1910  ;;  %v1766_v35 = vpack.c.bf16 %v466_v31, %v462_v30 }
 0x12d   : > { %v1913_v36 = vpop.eup %1912  ;;  %v754_v37 = vadd.f32 %v1911_v34, %v1909_v32  ;;  %1922 = vpow2.f32 %v1754_v33  ;;  %v575_v38 = vpack.c.bf16 %v1911_v34, %v1909_v32  ;;  %v769_v32 = vld [vmem:[%s2643_s6] sm:$0xff]  ;;  %v770_v34 = vld [vmem:[%s2643_s6 + $0x8] sm:$0xff] }
 0x12e   : > { %v496_v39 = vadd.f32 1.0, %v1913_v36  ;;  %1846 = vmatprep.subr.msk.bf16.mxu1 %vm2103_vm1, %v1766_v35 }
 0x12f   : > { %v1915_v43 = vpop.eup %1914  ;;  %1847 = vmatpush3.bf16.msk.msra.mxu1 %vm2103_vm1, %v1766_v35  ;;  %583 = vxpose.xlu0.c.b16.start [1/4] (short) %v575_v38, 128  ;;  %v771_v38 = vld [vmem:[%s2643_s6 + $0x10] sm:$0xff] }
 0x130   : > { %1924 = vrcp.f32 %v496_v39  ;;  %v497_v44 = vadd.f32 1.0, %v1915_v43  ;;  %v772_v39 = vld [vmem:[%s2643_s6 + $0x18] sm:$0xff] }
 0x132   : > { %v1917_v45 = vpop.eup %1916  ;;  %1926 = vrcp.f32 %v497_v44 }
 0x133   : > { %v755_v46 = vadd.f32 %v1917_v45, %v754_v37 }
 0x134   : > { %v1919_v47 = vpop.eup %1918 }
 0x135   : > { %v1921_v48 = vpop.eup %1920  ;;  %v756_v49 = vadd.f32 %v1919_v47, %v755_v46  ;;  %v576_v50 = vpack.c.bf16 %v1919_v47, %v1917_v45  ;;  %v773_v45 = vld [vmem:[%s2643_s6 + $0x20] sm:$0xff]  ;;  %v774_v46 = vld [vmem:[%s2643_s6 + $0x28] sm:$0xff] }
 0x136   : > { %v498_v51 = vadd.f32 1.0, %v1921_v48 }
 0x137   : > { %v1923_v52 = vpop.eup %1922  ;;  %584 = vxpose.xlu0.c.b16.cont [2/4] (short) %v576_v50, 128 }
 0x138   : > { %1928 = vrcp.f32 %v498_v51  ;;  %v499_v53 = vadd.f32 1.0, %v1923_v52  ;;  %v775_v51 = vld [vmem:[%s2643_s6 + $0x30] sm:$0xff] }
 0x13a   : > { %v1925_v54 = vpop.eup %1924  ;;  %1930 = vrcp.f32 %v499_v53 }
 0x13b   : > { %v757_v56 = vadd.f32 %v1925_v54, %v756_v49 }
 0x13c   : > { %v1927_v55 = vpop.eup %1926 }
 0x13d   : > { %v758_v57 = vadd.f32 %v1927_v55, %v757_v56  ;;  %v577_v58 = vpack.c.bf16 %v1927_v55, %v1925_v54  ;;  %v776_v54 = vld [vmem:[%s2643_s6 + $0x38] sm:$0xff]  ;;  %v777_v56 = vld [vmem:[%s2643_s6 + $0x40] sm:$0xff] }
 0x13f   : > { %585 = vxpose.xlu0.c.b16.cont [3/4] (short) %v577_v58, 128 }
 0x142   : > { %v1929_v59 = vpop.eup %1928 }
 0x143   : > { %v759_v60 = vadd.f32 %v1929_v59, %v758_v57 }
 0x144   : > { %v1931_v61 = vpop.eup %1930 }
 0x145   : > { %v760_v62 = vadd.f32 %v1931_v61, %v759_v60  ;;  %v578_v63 = vpack.c.bf16 %v1931_v61, %v1929_v59  ;;  %v778_v59 = vld [vmem:[%s2643_s6 + $0x48] sm:$0xff]  ;;  %v779_v60 = vld [vmem:[%s2643_s6 + $0x50] sm:$0xff] }
 0x147   : > { %v761_v0 = vrot.slane %v760_v62, 4  ;;  %586 = vxpose.xlu0.c.b16.end [4/4] (short) %v578_v63, 128  ;;  %v780_v63 = vld [vmem:[%s2643_s6 + $0x58] sm:$0xff] }
 0x149   : > { %v762_v1 = vadd.f32 %v761_v0, %v760_v62 }
 0x14b   : > { %v763_v2 = vrot.slane %v762_v1, 2 }
 0x14d   : > { %v764_v3 = vadd.f32 %v763_v2, %v762_v1 }
 0x14f   : > { %v765_v4 = vrot.slane %v764_v3, 1 }
 0x151   : > { %v766_v6 = vadd.f32 %v765_v4, %v764_v3  ;;  %v781_v3 = vld [vmem:[%s2643_s6 + $0x60] sm:$0xff]  ;;  %v782_v4 = vld [vmem:[%s2643_s6 + $0x68] sm:$0xff] }
 0x153   : > { %v767_v7 = vadd.f32 %v766_v6, %v753_v5 }
 0x155   : > { %768 = vst [vmem:[#allocation3] sm:$0x1] %v767_v7 }
 0x15c   : > { %v2146_v33 = vld [vmem:[#allocation3] ss:$0 sm:$0xff] }
 0x15d   : > { %v840_v36 = vmul.f32 %v2146_v33, %v769_v32  ;;  %v841_v48 = vmul.f32 %v2146_v33, %v770_v34  ;;  %v842_v0 = vmul.f32 %v2146_v33, %v771_v38 }
 0x15f   : > { %856 = vxpose.xlu0.b32.start [1/16] %v840_v36, 128  ;;  %v2283_v36 = vld [vmem:[%s2067_s9 + $0x8] sm:$0xff] }
 0x163   : > { %857 = vxpose.xlu0.b32.cont [2/16] %v841_v48, 128  ;;  %v2298_v48 = vld [vmem:[%s2067_s9 + $0x30] sm:$0xff] }
 0x167   : > { %858 = vxpose.xlu0.b32.cont [3/16] %v842_v0, 128  ;;  %v2319_v0 = vld [vmem:[%s2067_s9 + $0x68] sm:$0xff] }
 0x1a1   : > { %v591_v8 = vpop.trf.xlu0 }
 0x1a2   : > { %1848 = vmatprep.mubr.msk.bf16.mxu1 %vm599_vm2, %v591_v8  ;;  %v783_v8 = vld [vmem:[%s2643_s6 + $0x70] sm:$0xff] }
 0x1a5   : > { %v592_v9 = vpop.trf.xlu0 }
 0x1a6   : > { %1849 = vmatmul.mubr.msk.bf16.vlgmr.msra.gmra.mrb[0].mxu1 %vm599_vm2, %v592_v9 }
 0x1a9   : > { %v593_v10 = vpop.trf.xlu0 }
 0x1aa   : > { %1852 = vmatprep.mubr.msk.bf16.mxu1 %vm599_vm2, %v593_v10 }
 0x1ad   : > { %v594_v11 = vpop.trf.xlu0 }
 0x1ae   : > { %1853 = vmatmul.mubr.msk.bf16.gmra.mrb[4].mxu1 %vm599_vm2, %v594_v11  ;;  %v784_v11 = vld [vmem:[%s2643_s6 + $0x78] sm:$0xff] }
 0x1b1   : > { %v595_v12 = vpop.trf.xlu0 }
 0x1b2   : > { %1856 = vmatprep.mubr.msk.bf16.mxu1 %vm599_vm2, %v595_v12 }
 0x1b5   : > { %v596_v13 = vpop.trf.xlu0 }
 0x1b6   : > { %1857 = vmatmul.mubr.msk.bf16.gmra.mrb[8].mxu1 %vm599_vm2, %v596_v13 }
 0x1b9   : > { %v597_v14 = vpop.trf.xlu0 }
 0x1ba   : > { %1860 = vmatprep.mubr.msk.bf16.mxu1 %vm599_vm2, %v597_v14  ;;  %v843_v14 = vmul.f32 %v2146_v33, %v772_v39 }
 0x1bc   : > { %859 = vxpose.xlu0.b32.cont [4/16] %v843_v14, 128  ;;  %v2340_v14 = vld [vmem:[%s2641_s4 + $0x8] sm:$0xf] }
 0x1bd   : > { %v598_v15 = vpop.trf.xlu0 }
 0x1be   : > { %1861 = vmatmul.mubr.msk.bf16.gmra.mrb[12].mxu1 %vm599_vm2, %v598_v15 }
 0x279   : > { %v1850_v16 = vpop.f32.mrb[0].mxu1 }
 0x27a   : > { %v658_v17 = vpop.f32.mrb[1].mxu1  ;;  %v2162_v43 = vmul.f32 %v1850_v16, %v771_v38  ;;  %v844_v16 = vmul.f32 %v2146_v33, %v773_v45  ;;  %v2286_v38 = vld [vmem:[%s2067_s9 + $0x10] sm:$0xff] }
 0x27b   : > { %v1851_v18 = vpop.f32.mrb[2].mxu1  ;;  %v2151_v35 = vmul.f32 %v769_v32, %v658_v17  ;;  %v845_v17 = vmul.f32 %v2146_v33, %v774_v46  ;;  %v2270_v32 = vld [vmem:[%s2072_s12 + $0x3] ss:$0 sm:$0xff] }
 0x27c   : > { %v661_v19 = vpop.f32.mrb[3].mxu1  ;;  %v2164_v44 = vmul.f32 %v1851_v18, %v772_v39  ;;  %860 = vxpose.xlu0.b32.cont [5/16] %v844_v16, 128  ;;  %v846_v18 = vmul.f32 %v2146_v33, %v775_v51  ;;  %2654 = vst [vmem:[#allocation20_spill] sm:$0xff] %v2270_v32  ;;  %v2289_v39 = vld [vmem:[%s2067_s9 + $0x18] sm:$0xff]  ;;  %v2345_v16 = vld [vmem:[%s2641_s4 + $0xc] sm:$0xf] }
 0x27d   : > { %v2154_v37 = vmul.f32 %v770_v34, %v661_v19  ;;  %v847_v19 = vmul.f32 %v2146_v33, %v776_v54  ;;  %v2280_v34 = vld [vmem:[%s2642_s5 + $0x2] ss:$0 sm:$0xff] }
 0x280   : > { %861 = vxpose.xlu0.b32.cont [6/16] %v845_v17, 128  ;;  %v2350_v17 = vld [vmem:[%s2641_s4 + $0x10] sm:$0xf] }
 0x281   : > { %v1854_v20 = vpop.f32.mrb[4].mxu1 }
 0x282   : > { %v674_v21 = vpop.f32.mrb[5].mxu1  ;;  %v2184_v53 = vmul.f32 %v1854_v20, %v775_v51  ;;  %v848_v20 = vmul.f32 %v2146_v33, %v777_v56  ;;  %v2301_v51 = vld [vmem:[%s2067_s9 + $0x38] sm:$0xff] }
 0x283   : > { %v1855_v22 = vpop.f32.mrb[6].mxu1  ;;  %v2175_v49 = vmul.f32 %v773_v45, %v674_v21  ;;  %v849_v21 = vmul.f32 %v2146_v33, %v778_v59  ;;  %v2292_v45 = vld [vmem:[%s2067_s9 + $0x20] sm:$0xff] }
 0x284   : > { %v677_v23 = vpop.f32.mrb[7].mxu1  ;;  %v2194_v57 = vmul.f32 %v1855_v22, %v776_v54  ;;  %862 = vxpose.xlu0.b32.cont [7/16] %v846_v18, 128  ;;  %v850_v22 = vmul.f32 %v2146_v33, %v779_v60  ;;  %v2304_v54 = vld [vmem:[%s2067_s9 + $0x40] sm:$0xff]  ;;  %v2355_v18 = vld [vmem:[%s2641_s4 + $0x14] sm:$0xf] }
 0x285   : > { %v2177_v50 = vmul.f32 %v774_v46, %v677_v23  ;;  %v851_v23 = vmul.f32 %v2146_v33, %v780_v63  ;;  %v2295_v46 = vld [vmem:[%s2067_s9 + $0x28] sm:$0xff] }
 0x288   : > { %863 = vxpose.xlu0.b32.cont [8/16] %v847_v19, 128  ;;  %v2360_v19 = vld [vmem:[%s2641_s4 + $0x18] sm:$0xf] }
 0x289   : > { %v1858_v24 = vpop.f32.mrb[8].mxu1  ;;  %2655 = vst [vmem:[#allocation21_spill] sm:$0xff] %v2360_v19 }
 0x28a   : > { %v690_v25 = vpop.f32.mrb[9].mxu1  ;;  %v2206_v62 = vmul.f32 %v1858_v24, %v779_v60  ;;  %v852_v24 = vmul.f32 %v2146_v33, %v781_v3  ;;  %v2313_v60 = vld [vmem:[%s2067_s9 + $0x58] sm:$0xff] }
 0x28b   : > { %v1859_v26 = vpop.f32.mrb[10].mxu1  ;;  %v2196_v58 = vmul.f32 %v777_v56, %v690_v25  ;;  %v853_v25 = vmul.f32 %v2146_v33, %v782_v4  ;;  %v2307_v56 = vld [vmem:[%s2067_s9 + $0x48] sm:$0xff] }
 0x28c   : > { %v693_v27 = vpop.f32.mrb[11].mxu1  ;;  %v2214_v2 = vmul.f32 %v1859_v26, %v780_v63  ;;  %864 = vxpose.xlu0.b32.cont [9/16] %v848_v20, 128  ;;  %v854_v26 = vmul.f32 %v2146_v33, %v783_v8  ;;  %v2316_v63 = vld [vmem:[%s2067_s9 + $0x60] sm:$0xff]  ;;  %v2365_v20 = vld [vmem:[%s2641_s4 + $0x1c] sm:$0xf] }
 0x28d   : > { %v2204_v61 = vmul.f32 %v778_v59, %v693_v27  ;;  %v855_v27 = vmul.f32 %v2146_v33, %v784_v11  ;;  %v2275_v33 = vld [vmem:[%s2642_s5 + $0x1] ss:$0 sm:$0xff]  ;;  %v2310_v59 = vld [vmem:[%s2067_s9 + $0x50] sm:$0xff]  ;;  %2656 = vst [vmem:[#allocation22_spill] sm:$0xff] %v2365_v20 }
 0x290   : > { %865 = vxpose.xlu0.b32.cont [10/16] %v849_v21, 128  ;;  %v2370_v21 = vld [vmem:[%s2641_s4 + $0x20] sm:$0xf] }
 0x291   : > { %v1862_v28 = vpop.f32.mrb[12].mxu1  ;;  %2657 = vst [vmem:[#allocation23_spill] sm:$0xff] %v2370_v21 }
 0x292   : > { %v706_v29 = vpop.f32.mrb[13].mxu1  ;;  %v2233_v10 = vmul.f32 %v1862_v28, %v783_v8  ;;  %v2258_v28 = vld [vmem:[%s2072_s12 + $0x1] ss:$8 sm:$0x3] }
 0x293   : > { %v1863_v30 = vpop.f32.mrb[14].mxu1  ;;  %v2224_v6 = vmul.f32 %v781_v3, %v706_v29  ;;  %v2261_v29 = vld [vmem:[%s2072_s12 + $0x2] ss:$0 sm:$0xff]  ;;  %v2322_v3 = vld [vmem:[%s2067_s9 + $0x70] sm:$0xff] }
 0x294   : > { %v709_v31 = vpop.f32.mrb[15].mxu1  ;;  %v2240_v13 = vmul.f32 %v1863_v30, %v784_v11  ;;  %866 = vxpose.xlu0.b32.cont [11/16] %v850_v22, 128  ;;  %2652 = vst [vmem:[#allocation18_spill] sm:$0xff] %v2261_v29  ;;  %v2264_v30 = vld [vmem:[%s2067_s9] sm:$0xff] }
 0x295   : > { %v2226_v7 = vmul.f32 %v782_v4, %v709_v31  ;;  %v2267_v31 = vld [vmem:[%s2072_s12 + $0xa] ss:$0 sm:$0xff]  ;;  %v2325_v4 = vld [vmem:[%s2067_s9 + $0x78] sm:$0xff]  ;;  %v2330_v8 = vld [vmem:[%s2641_s4] sm:$0xf] }
 0x296   : > { %2653 = vst [vmem:[#allocation19_spill] sm:$0xff] %v2267_v31  ;;  %v2335_v11 = vld [vmem:[%s2641_s4 + $0x4] sm:$0xf] }
 0x297   : > { %v2375_v22 = vld [vmem:[%s2641_s4 + $0x24] sm:$0xf] }
 0x298   : > { %867 = vxpose.xlu0.b32.cont [12/16] %v851_v23, 128  ;;  %2658 = vst [vmem:[#allocation24_spill] sm:$0xff] %v2375_v22  ;;  %v2380_v23 = vld [vmem:[%s2641_s4 + $0x28] sm:$0xf] }
 0x299   : > { %2659 = vst [vmem:[#allocation25_spill] sm:$0xff] %v2380_v23 }
 0x29c   : > { %868 = vxpose.xlu0.b32.cont [13/16] %v852_v24, 128  ;;  %v2385_v24 = vld [vmem:[%s2641_s4 + $0x2c] sm:$0xf] }
 0x29d   : > { %2660 = vst [vmem:[#allocation26_spill] sm:$0xff] %v2385_v24 }
 0x2a0   : > { %869 = vxpose.xlu0.b32.cont [14/16] %v853_v25, 128  ;;  %v2390_v25 = vld [vmem:[%s2641_s4 + $0x30] sm:$0xf] }
 0x2a1   : > { %2661 = vst [vmem:[#allocation27_spill] sm:$0xff] %v2390_v25 }
 0x2a4   : > { %870 = vxpose.xlu0.b32.cont [15/16] %v854_v26, 128  ;;  %v2395_v26 = vld [vmem:[%s2641_s4 + $0x34] sm:$0xf] }
 0x2a5   : > { %2662 = vst [vmem:[#allocation28_spill] sm:$0xff] %v2395_v26 }
 0x2a8   : > { %871 = vxpose.xlu0.b32.end [16/16] %v855_v27, 128  ;;  %v2400_v27 = vld [vmem:[%s2641_s4 + $0x38] sm:$0xf] }
 0x2a9   : > { %2663 = vst [vmem:[#allocation29_spill] sm:$0xff] %v2400_v27 }
 0x2ec   : > { %v872_v42 = vpop.trf.xlu0 }
 0x2f0   : > { %v873_v15 = vpop.trf.xlu0 }
 0x2f1   : > { %v888_v12 = vpack.c.bf16 %v873_v15, %v872_v42 }
 0x2f4   : > { %v874_v9 = vpop.trf.xlu0 }
 0x2f8   : > { %v875_v5 = vpop.trf.xlu0 }
 0x2f9   : > { %v889_v1 = vpack.c.bf16 %v875_v5, %v874_v9 }
 0x2fc   : > { %v876_v55 = vpop.trf.xlu0 }
 0x300   : > { %v877_v52 = vpop.trf.xlu0 }
 0x301   : > { %v890_v47 = vpack.c.bf16 %v877_v52, %v876_v55 }
 0x304   : > { %v878_v32 = vpop.trf.xlu0 }
 0x308   : > { %v879_v31 = vpop.trf.xlu0 }
 0x309   : > { %v891_v29 = vpack.c.bf16 %v879_v31, %v878_v32 }
 0x30c   : > { %v880_v25 = vpop.trf.xlu0 }
 0x310   : > { %v881_v26 = vpop.trf.xlu0 }
 0x311   : > { %v892_v27 = vpack.c.bf16 %v881_v26, %v880_v25 }
 0x314   : > { %v882_v23 = vpop.trf.xlu0 }
 0x318   : > { %v883_v24 = vpop.trf.xlu0 }
 0x319   : > { %v893_v21 = vpack.c.bf16 %v883_v24, %v882_v23 }
 0x31c   : > { %v884_v22 = vpop.trf.xlu0 }
 0x320   : > { %v885_v41 = vpop.trf.xlu0 }
 0x321   : > { %v894_v19 = vpack.c.bf16 %v885_v41, %v884_v22 }
 0x324   : > { %v886_v20 = vpop.trf.xlu0 }
 0x328   : > { %v887_v42 = vpop.trf.xlu0 }
 0x329   : > { %v895_v15 = vpack.c.bf16 %v887_v42, %v886_v20 }
 0x32a   : > { %v992_v5 = vld [vmem:[%s2644_s7] sm:$0xff]  ;;  %v994_v52 = vld [vmem:[%s2644_s7 + $0x8] sm:$0xff]  ;;  %v996_v55 = vld [vmem:[%s2644_s7 + $0x10] sm:$0xff] }
 0x32b   : > { %v998_v9 = vld [vmem:[%s2644_s7 + $0x18] sm:$0xff] }
 0x32c   : > { %1007 = vsyncadd [#allocation11], 512 }
 0x32d   : > { %2002 = dma.done.wait [#allocation11], 512 }
 0x32e   : > { %2003 = vsyncadd [#allocation11], 4294966784  ;;  %v1779_v41 = vcombine.high %v2264_v30, %v2283_v36  ;;  %v1778_v31 = vcombine.low %v2264_v30, %v2283_v36  ;;  %v1781_v32 = vcombine.high %v2286_v38, %v2289_v39  ;;  %1232 = vmatprep.subr.bf16.mxu0 %v888_v12  ;;  %v2665_v20 = vpack.c.bf16 %v2154_v37, %v2151_v35 }
 0x32f   : > { %v1780_v22 = vcombine.low %v2286_v38, %v2289_v39  ;;  %v1783_v23 = vcombine.high %v2292_v45, %v2295_v46  ;;  %v2013_v24 = vmov 0   ;;  %v2666_v12 = vpack.c.bf16 %v2164_v44, %v2162_v43 }
 0x330   : > { %1233 = vmatpush1.bf16.msra.mxu0 %v2665_v20  ;;  %1107 = vmatprep.subr.bf16.mxu1 %v1779_v41  ;;  %v1782_v35 = vcombine.low %v2292_v45, %v2295_v46  ;;  %v1785_v37 = vcombine.high %v2298_v48, %v2301_v51  ;;  %v1784_v43 = vcombine.low %v2298_v48, %v2301_v51 }
 0x331   : > { %1108 = vmatpush1.bf16.msra.mxu1 %v1778_v31  ;;  %1234 = vmatprep.subr.bf16.mxu0 %v889_v1  ;;  %v2667_v1 = vpack.c.bf16 %v2177_v50, %v2175_v49  ;;  %v1787_v44 = vcombine.high %v2304_v54, %v2307_v56  ;;  %v1786_v30 = vcombine.low %v2304_v54, %v2307_v56 }
 0x332   : > { %1109 = vmatprep.subr.bf16.mxu1 %v1781_v32  ;;  %1139 = vmatprep.mubr.bf16.mxu1 %v2013_v24  ;;  %v1789_v49 = vcombine.high %v2310_v59, %v2313_v60  ;;  %v2669_v50 = vpack.c.bf16 %v2204_v61, %v2196_v58  ;;  %v1790_v36 = vcombine.low %v2316_v63, %v2319_v0 }
 0x333   : > { %1264 = vmatprep.mubr.bf16.mxu0 %v2013_v24  ;;  %v1793_v58 = vcombine.high %v2322_v3, %v2325_v4  ;;  %v2671_v61 = vpack.c.bf16 %v2226_v7, %v2224_v6  ;;  %v1792_v38 = vcombine.low %v2322_v3, %v2325_v4 }
 0x334   : > { %1235 = vmatpush1.bf16.msra.mxu0 %v2666_v12 }
 0x335   : > { %1236 = vmatprep.subr.bf16.mxu0 %v890_v47  ;;  %1110 = vmatpush1.bf16.msra.mxu1 %v1780_v22  ;;  %v2668_v47 = vpack.c.bf16 %v2194_v57, %v2184_v53  ;;  %v1791_v53 = vcombine.high %v2316_v63, %v2319_v0  ;;  %v2670_v57 = vpack.c.bf16 %v2214_v2, %v2206_v62  ;;  %v2673_v2 = vsub.s32 1, %v2087_v40 }
 0x336   : > { %1111 = vmatprep.subr.bf16.mxu1 %v1783_v23  ;;  %v2672_v62 = vpack.c.bf16 %v2240_v13, %v2233_v10 }
 0x337   : > { %v1024_v6 = vrot.slane %v2258_v28, %v2673_v2 }
 0x338   : > { %1237 = vmatpush1.bf16.msra.mxu0 %v2667_v1 }
 0x339   : > { %1238 = vmatprep.subr.bf16.mxu0 %v891_v29  ;;  %1112 = vmatpush1.bf16.msra.mxu1 %v1782_v35  ;;  %v1788_v29 = vcombine.low %v2310_v59, %v2313_v60 }
 0x33a   : > { %1113 = vmatprep.subr.bf16.mxu1 %v1785_v37 }
 0x33c   : > { %1239 = vmatpush1.bf16.msra.mxu0 %v2668_v47 }
 0x33d   : > { %1240 = vmatprep.subr.bf16.mxu0 %v892_v27  ;;  %1114 = vmatpush1.bf16.msra.mxu1 %v1784_v43 }
 0x33e   : > { %1115 = vmatprep.subr.bf16.mxu1 %v1787_v44 }
 0x340   : > { %1241 = vmatpush1.bf16.msra.mxu0 %v2669_v50 }
 0x341   : > { %1242 = vmatprep.subr.bf16.mxu0 %v893_v21  ;;  %1116 = vmatpush1.bf16.msra.mxu1 %v1786_v30 }
 0x342   : > { %1117 = vmatprep.subr.bf16.mxu1 %v1789_v49 }
 0x344   : > { %1243 = vmatpush1.bf16.msra.mxu0 %v2670_v57 }
 0x345   : > { %1244 = vmatprep.subr.bf16.mxu0 %v894_v19  ;;  %1118 = vmatpush1.bf16.msra.mxu1 %v1788_v29 }
 0x346   : > { %1119 = vmatprep.subr.bf16.mxu1 %v1791_v53 }
 0x348   : > { %1245 = vmatpush1.bf16.msra.mxu0 %v2671_v61 }
 0x349   : > { %1246 = vmatprep.subr.bf16.mxu0 %v895_v15  ;;  %1120 = vmatpush1.bf16.msra.mxu1 %v1790_v36 }
 0x34a   : > { %1121 = vmatprep.subr.bf16.mxu1 %v1793_v58 }
 0x34c   : > { %1247 = vmatpush1.bf16.msra.mxu0 %v2672_v62 }
 0x34d   : > { %1122 = vmatpush1.bf16.msra.mxu1 %v1792_v38 }
 0x350   : > { %1140 = vmatmul.mubr.bf16.vlgmr.msra.gmra.mrb[16].mxu1 %v992_v5 }
 0x351   : > { %1149 = vmatprep.mubr.bf16.mxu1 %v2013_v24 }
 0x358   : > { %1150 = vmatmul.mubr.bf16.gmra.mrb[20].mxu1 %v994_v52 }
 0x359   : > { %1159 = vmatprep.mubr.bf16.mxu1 %v2013_v24 }
 0x360   : > { %1160 = vmatmul.mubr.bf16.gmra.mrb[24].mxu1 %v996_v55 }
 0x361   : > { %1169 = vmatprep.mubr.bf16.mxu1 %v2013_v24 }
 0x368   : > { %1170 = vmatmul.mubr.bf16.gmra.mrb[28].mxu1 %v998_v9 }
 0x423   : > { %v2483_v7 = vpop.f32.mrb[16].mxu1 }
 0x424   : > { %v1143_v39 = vpop.f32.mrb[17].mxu1 }
 0x425   : > { %v1144_v10 = vadd.f32 %v1143_v39, %v1024_v6  ;;  %v2485_v13 = vpop.f32.mrb[18].mxu1 }
 0x426   : > { %v1147_v45 = vpop.f32.mrb[19].mxu1 }
 0x427   : > { %v1794_v46 = vmul.f32 -1.442695, %v1144_v10  ;;  %v1148_v48 = vadd.f32 %v1147_v45, %v1024_v6 }
 0x429   : > { %1932 = vpow2.f32 %v1794_v46  ;;  %v1795_v51 = vmul.f32 -1.442695, %v1148_v48 }
 0x42b   : > { %1934 = vpow2.f32 %v1795_v51  ;;  %v2487_v54 = vpop.f32.mrb[20].mxu1 }
 0x42c   : > { %v1153_v56 = vpop.f32.mrb[21].mxu1 }
 0x42d   : > { %v1154_v59 = vadd.f32 %v1153_v56, %v1024_v6  ;;  %v2489_v60 = vpop.f32.mrb[22].mxu1 }
 0x42e   : > { %v1157_v63 = vpop.f32.mrb[23].mxu1 }
 0x42f   : > { %v1796_v0 = vmul.f32 -1.442695, %v1154_v59  ;;  %v1158_v3 = vadd.f32 %v1157_v63, %v1024_v6 }
 0x431   : > { %1936 = vpow2.f32 %v1796_v0  ;;  %v1797_v4 = vmul.f32 -1.442695, %v1158_v3 }
 0x433   : > { %v1933_v19 = vpop.eup %1932  ;;  %1938 = vpow2.f32 %v1797_v4  ;;  %v2491_v21 = vpop.f32.mrb[24].mxu1 }
 0x434   : > { %v1204_v25 = vadd.f32 1.0, %v1933_v19  ;;  %v1163_v26 = vpop.f32.mrb[25].mxu1 }
 0x435   : > { %v1935_v27 = vpop.eup %1934  ;;  %v1164_v42 = vadd.f32 %v1163_v26, %v1024_v6  ;;  %v2493_v15 = vpop.f32.mrb[26].mxu1 }
 0x436   : > { %v1205_v5 = vadd.f32 1.0, %v1935_v27  ;;  %v1167_v52 = vpop.f32.mrb[27].mxu1  ;;  %1940 = vrcp.f32 %v1204_v25 }
 0x437   : > { %v1798_v55 = vmul.f32 -1.442695, %v1164_v42  ;;  %v1168_v9 = vadd.f32 %v1167_v52, %v1024_v6 }
 0x438   : > { %1942 = vrcp.f32 %v1205_v5 }
 0x439   : > { %1944 = vpow2.f32 %v1798_v55  ;;  %v1799_v41 = vmul.f32 -1.442695, %v1168_v9 }
 0x43b   : > { %v1937_v31 = vpop.eup %1936  ;;  %1946 = vpow2.f32 %v1799_v41  ;;  %v2495_v32 = vpop.f32.mrb[28].mxu1 }
 0x43c   : > { %v1206_v20 = vadd.f32 1.0, %v1937_v31  ;;  %v1173_v22 = vpop.f32.mrb[29].mxu1 }
 0x43d   : > { %v1939_v23 = vpop.eup %1938  ;;  %v1174_v12 = vadd.f32 %v1173_v22, %v1024_v6  ;;  %v2497_v35 = vpop.f32.mrb[30].mxu1 }
 0x43e   : > { %v1207_v37 = vadd.f32 1.0, %v1939_v23  ;;  %v1177_v1 = vpop.f32.mrb[31].mxu1  ;;  %1948 = vrcp.f32 %v1206_v20 }
 0x43f   : > { %v1800_v43 = vmul.f32 -1.442695, %v1174_v12  ;;  %v1178_v44 = vadd.f32 %v1177_v1, %v1024_v6 }
 0x440   : > { %1950 = vrcp.f32 %v1207_v37  ;;  %v1941_v47 = vpop.eup %1940 }
 0x441   : > { %1952 = vpow2.f32 %v1800_v43  ;;  %v1801_v30 = vmul.f32 -1.442695, %v1178_v44 }
 0x442   : > { %v1943_v49 = vpop.eup %1942 }
 0x443   : > { %v1945_v50 = vpop.eup %1944  ;;  %1954 = vpow2.f32 %v1801_v30  ;;  %v1228_v29 = vpack.c.bf16 %v1943_v49, %v1941_v47 }
 0x444   : > { %v1208_v53 = vadd.f32 1.0, %v1945_v50 }
 0x445   : > { %v1947_v57 = vpop.eup %1946  ;;  %1265 = vmatmul.mubr.bf16.vlgmr.msra.gmra.mrb[16].mxu0 %v1228_v29 }
 0x446   : > { %v1209_v36 = vadd.f32 1.0, %v1947_v57  ;;  %1274 = vmatprep.mubr.bf16.mxu0 %v2013_v24  ;;  %1956 = vrcp.f32 %v1208_v53 }
 0x448   : > { %1958 = vrcp.f32 %v1209_v36  ;;  %v1949_v58 = vpop.eup %1948 }
 0x44a   : > { %v1951_v61 = vpop.eup %1950 }
 0x44b   : > { %v1953_v38 = vpop.eup %1952  ;;  %v1229_v62 = vpack.c.bf16 %v1951_v61, %v1949_v58 }
 0x44c   : > { %v1210_v2 = vadd.f32 1.0, %v1953_v38 }
 0x44d   : > { %v1955_v6 = vpop.eup %1954  ;;  %1275 = vmatmul.mubr.bf16.gmra.mrb[20].mxu0 %v1229_v62 }
 0x44e   : > { %v1211_v39 = vadd.f32 1.0, %v1955_v6  ;;  %1284 = vmatprep.mubr.bf16.mxu0 %v2013_v24  ;;  %1960 = vrcp.f32 %v1210_v2 }
 0x450   : > { %1962 = vrcp.f32 %v1211_v39  ;;  %v1957_v10 = vpop.eup %1956 }
 0x452   : > { %v1959_v45 = vpop.eup %1958 }
 0x453   : > { %v1230_v46 = vpack.c.bf16 %v1959_v45, %v1957_v10 }
 0x455   : > { %1285 = vmatmul.mubr.bf16.gmra.mrb[24].mxu0 %v1230_v46 }
 0x456   : > { %1294 = vmatprep.mubr.bf16.mxu0 %v2013_v24 }
 0x458   : > { %v1961_v48 = vpop.eup %1960 }
 0x45a   : > { %v1963_v51 = vpop.eup %1962 }
 0x45b   : > { %v1231_v56 = vpack.c.bf16 %v1963_v51, %v1961_v48 }
 0x45d   : > { %1295 = vmatmul.mubr.bf16.gmra.mrb[28].mxu0 %v1231_v56 }
 0x518   : > { %v1266_v59 = vpop.f32.mrb[16].mxu0 }
 0x519   : > { %v1268_v63 = vpop.f32.mrb[17].mxu0 }
 0x51a   : > { %v1309_v0 = vadd.f32 %v2275_v33, %v1268_v63  ;;  %v1270_v3 = vpop.f32.mrb[18].mxu0 }
 0x51b   : > { %v1272_v4 = vpop.f32.mrb[19].mxu0 }
 0x51c   : > { %1964 = vrcp.f32 %v1309_v0  ;;  %v1310_v19 = vadd.f32 %v2275_v33, %v1272_v4 }
 0x51e   : > { %1966 = vrcp.f32 %v1310_v19 }
 0x520   : > { %v1276_v25 = vpop.f32.mrb[20].mxu0 }
 0x521   : > { %v1278_v26 = vpop.f32.mrb[21].mxu0 }
 0x522   : > { %v1311_v27 = vadd.f32 %v2275_v33, %v1278_v26  ;;  %v1280_v42 = vpop.f32.mrb[22].mxu0 }
 0x523   : > { %v1282_v24 = vpop.f32.mrb[23].mxu0 }
 0x524   : > { %1968 = vrcp.f32 %v1311_v27  ;;  %v1312_v5 = vadd.f32 %v2275_v33, %v1282_v24 }
 0x526   : > { %v1965_v52 = vpop.eup %1964  ;;  %1970 = vrcp.f32 %v1312_v5 }
 0x527   : > { %v1325_v55 = vmul.f32 %v1965_v52, %v1266_v59 }
 0x528   : > { %v1967_v9 = vpop.eup %1966  ;;  %v1286_v41 = vpop.f32.mrb[24].mxu0 }
 0x529   : > { %1333 = vadd.xlane.f32.xlu0 %v1325_v55  ;;  %v1288_v31 = vpop.f32.mrb[25].mxu0  ;;  %v1326_v20 = vmul.f32 %v1967_v9, %v1270_v3 }
 0x52a   : > { %v1313_v22 = vadd.f32 %v2275_v33, %v1288_v31  ;;  %v1290_v23 = vpop.f32.mrb[26].mxu0 }
 0x52b   : > { %v1292_v12 = vpop.f32.mrb[27].mxu0 }
 0x52c   : > { %1972 = vrcp.f32 %v1313_v22  ;;  %v1314_v37 = vadd.f32 %v2275_v33, %v1292_v12 }
 0x52d   : > { %1335 = vadd.xlane.f32.xlu0 %v1326_v20 }
 0x52e   : > { %v1969_v1 = vpop.eup %1968  ;;  %1974 = vrcp.f32 %v1314_v37 }
 0x52f   : > { %v1327_v43 = vmul.f32 %v1969_v1, %v1276_v25 }
 0x530   : > { %v1971_v44 = vpop.eup %1970  ;;  %v1296_v47 = vpop.f32.mrb[28].mxu0 }
 0x531   : > { %1337 = vadd.xlane.f32.xlu1 %v1327_v43  ;;  %v1298_v30 = vpop.f32.mrb[29].mxu0  ;;  %v1328_v49 = vmul.f32 %v1971_v44, %v1280_v42 }
 0x532   : > { %v1315_v50 = vadd.f32 %v2275_v33, %v1298_v30  ;;  %v1300_v29 = vpop.f32.mrb[30].mxu0  ;;  %v1805_v30 = vcombine.low %v2330_v8, %v2335_v11  ;;  %v1807_v11 = vcombine.low %v2350_v17, %v2355_v18  ;;  %v2681_v17 = vld [vmem:[#allocation27_spill] sm:$0xff] }
 0x533   : > { %v1302_v53 = vpop.f32.mrb[31].mxu0 }
 0x534   : > { %1976 = vrcp.f32 %v1315_v50  ;;  %v1316_v57 = vadd.f32 %v2275_v33, %v1302_v53  ;;  %1864 = vmatprep.subr.bf16.mxu1 %v1805_v30 }
 0x535   : > { %1339 = vadd.xlane.f32.xlu1 %v1328_v49  ;;  %1865 = vmatpush3.bf16.msra.mxu1 %v1805_v30 }
 0x536   : > { %v1973_v36 = vpop.eup %1972  ;;  %1978 = vrcp.f32 %v1316_v57  ;;  %v1806_v57 = vcombine.low %v2340_v14, %v2345_v16  ;;  %v2675_v14 = vld [vmem:[#allocation21_spill] sm:$0xff] }
 0x537   : > { %v1329_v58 = vmul.f32 %v1973_v36, %v1286_v41 }
 0x538   : > { %v1975_v61 = vpop.eup %1974  ;;  %1866 = vmatprep.subr.bf16.mxu1 %v1806_v57 }
 0x539   : > { %1341 = vadd.xlane.f32.xlu0 %v1329_v58  ;;  %v1330_v38 = vmul.f32 %v1975_v61, %v1290_v23  ;;  %1867 = vmatpush3.bf16.msra.mxu1 %v1806_v57  ;;  %v2674_v61 = vld [vmem:[#allocation22_spill] sm:$0xff] }
 0x53a   : > { %1868 = vmatprep.subr.bf16.mxu1 %v1807_v11  ;;  %v1808_v16 = vcombine.low %v2675_v14, %v2674_v61 }
 0x53b   : > { %1343 = vadd.xlane.f32.xlu1 %v1330_v38 }
 0x53d   : > { %1869 = vmatpush3.bf16.msra.mxu1 %v1807_v11 }
 0x53e   : > { %v1977_v62 = vpop.eup %1976  ;;  %1870 = vmatprep.subr.bf16.mxu1 %v1808_v16 }
 0x53f   : > { %v1331_v2 = vmul.f32 %v1977_v62, %v1296_v47 }
 0x540   : > { %v1979_v6 = vpop.eup %1978 }
 0x541   : > { %1345 = vadd.xlane.f32.xlu0 %v1331_v2  ;;  %v1332_v39 = vmul.f32 %v1979_v6, %v1300_v29  ;;  %1871 = vmatpush3.bf16.msra.mxu1 %v1808_v16  ;;  %v2679_v6 = vld [vmem:[#allocation25_spill] sm:$0xff] }
 0x543   : > { %1347 = vadd.xlane.f32.xlu1 %v1332_v39 }
 0x5b6   : > { %v1334_v10 = vpop.xlane.xlu0 %1333 }
 0x5b7   : > { %v1349_v45 = vmul.f32 0.015625, %v1334_v10  ;;  %v2680_v10 = vld [vmem:[#allocation28_spill] sm:$0xff] }
 0x5b8   : > { %v1811_v18 = vcombine.low %v2681_v17, %v2680_v10 }
 0x5b9   : > { %v1357_v46 = vsub.f32 %v1325_v55, %v1349_v45  ;;  %v2682_v45 = vld [vmem:[#allocation30_spill] sm:$0xff] }
 0x5ba   : > { %v1336_v48 = vpop.xlane.xlu0 %1335 }
 0x5bb   : > { %v2511_v33 = vmul.f32 %v2280_v34, %v1357_v46  ;;  %v1350_v51 = vmul.f32 0.015625, %v1336_v48  ;;  %v2683_v46 = vld [vmem:[#allocation29_spill] sm:$0xff] }
 0x5bc   : > { %v1812_v48 = vcombine.low %v2683_v46, %v2682_v45 }
 0x5bd   : > { %v1358_v56 = vsub.f32 %v1326_v20, %v1350_v51  ;;  %v1377_v59 = vmul.f32 %v2511_v33, %v2511_v33 }
 0x5be   : > { %v1338_v63 = vpop.xlane.xlu1 %1337 }
 0x5bf   : > { %v2516_v0 = vmul.f32 %v2280_v34, %v1358_v56  ;;  %v1351_v3 = vmul.f32 0.015625, %v1338_v63  ;;  %1385 = vadd.xlane.f32.xlu0 %v1377_v59 }
 0x5c1   : > { %v1359_v4 = vsub.f32 %v1327_v43, %v1351_v3  ;;  %v1378_v19 = vmul.f32 %v2516_v0, %v2516_v0 }
 0x5c2   : > { %v1340_v25 = vpop.xlane.xlu1 %1339 }
 0x5c3   : > { %v2521_v26 = vmul.f32 %v2280_v34, %v1359_v4  ;;  %v1352_v27 = vmul.f32 0.015625, %v1340_v25  ;;  %1387 = vadd.xlane.f32.xlu1 %v1378_v19 }
 0x5c5   : > { %v1360_v42 = vsub.f32 %v1328_v49, %v1352_v27  ;;  %v1379_v24 = vmul.f32 %v2521_v26, %v2521_v26 }
 0x5c6   : > { %v1342_v5 = vpop.xlane.xlu0 %1341 }
 0x5c7   : > { %v2526_v52 = vmul.f32 %v2280_v34, %v1360_v42  ;;  %v1353_v55 = vmul.f32 0.015625, %v1342_v5  ;;  %1389 = vadd.xlane.f32.xlu0 %v1379_v24 }
 0x5c8   : > { %v1344_v9 = vpop.xlane.xlu1 %1343 }
 0x5c9   : > { %v1361_v41 = vsub.f32 %v1329_v58, %v1353_v55  ;;  %v1354_v31 = vmul.f32 0.015625, %v1344_v9  ;;  %v1380_v20 = vmul.f32 %v2526_v52, %v2526_v52  ;;  %v2684_v9 = vsub.s32 0, %v2087_v40 }
 0x5cb   : > { %v2531_v22 = vmul.f32 %v2280_v34, %v1361_v41  ;;  %v1362_v23 = vsub.f32 %v1330_v38, %v1354_v31  ;;  %1391 = vadd.xlane.f32.xlu1 %v1380_v20  ;;  %v2677_v38 = vld [vmem:[#allocation23_spill] sm:$0xff]  ;;  %v2569_v41 = vrot.slane %v2258_v28, %v2684_v9 }
 0x5cd   : > { %v2534_v12 = vmul.f32 %v2280_v34, %v1362_v23  ;;  %v1381_v37 = vmul.f32 %v2531_v22, %v2531_v22  ;;  %v1146_v40 = vadd.f32 %v2485_v13, %v2569_v41  ;;  %v1152_v10 = vadd.f32 %v2487_v54, %v2569_v41 }
 0x5ce   : > { %v1346_v1 = vpop.xlane.xlu0 %1345  ;;  %v1156_v17 = vadd.f32 %v2489_v60, %v2569_v41 }
 0x5cf   : > { %v1355_v43 = vmul.f32 0.015625, %v1346_v1  ;;  %1393 = vadd.xlane.f32.xlu0 %v1381_v37  ;;  %v1382_v44 = vmul.f32 %v2534_v12, %v2534_v12  ;;  %v2685_v1 = vld [vmem:[#allocation18_spill] sm:$0xff] }
 0x5d0   : > { %v1348_v47 = vpop.xlane.xlu1 %1347 }
 0x5d1   : > { %v1363_v49 = vsub.f32 %v1331_v2, %v1355_v43  ;;  %v1356_v50 = vmul.f32 0.015625, %v1348_v47  ;;  %1395 = vadd.xlane.f32.xlu1 %v1382_v44  ;;  %v2678_v2 = vld [vmem:[#allocation26_spill] sm:$0xff] }
 0x5d3   : > { %v2543_v29 = vmul.f32 %v2280_v34, %v1363_v49  ;;  %v1364_v53 = vsub.f32 %v1332_v39, %v1356_v50  ;;  %v1810_v39 = vcombine.low %v2679_v6, %v2678_v2  ;;  %v1142_v49 = vadd.f32 %v2483_v7, %v2569_v41 }
 0x5d5   : > { %v2548_v36 = vmul.f32 %v2280_v34, %v1364_v53  ;;  %v1383_v58 = vmul.f32 %v2543_v29, %v2543_v29  ;;  %v2676_v34 = vld [vmem:[#allocation24_spill] sm:$0xff]  ;;  %v2686_v53 = vld [vmem:[#allocation19_spill] sm:$0xff] }
 0x5d6   : > { %v1809_v62 = vcombine.low %v2677_v38, %v2676_v34 }
 0x5d7   : > { %1397 = vadd.xlane.f32.xlu0 %v1383_v58  ;;  %v1384_v8 = vmul.f32 %v2548_v36, %v2548_v36 }
 0x5d8   : > { %1872 = vmatprep.subr.bf16.mxu1 %v1809_v62 }
 0x5d9   : > { %1399 = vadd.xlane.f32.xlu1 %v1384_v8  ;;  %1873 = vmatpush3.bf16.msra.mxu1 %v1809_v62  ;;  %v2687_v8 = vld [vmem:[#allocation20_spill] sm:$0xff] }
 0x5da   : > { %1874 = vmatprep.subr.bf16.mxu1 %v1810_v39  ;;  %v1449_v11 = vadd.f32 %v1142_v49, %v2687_v8  ;;  %v1450_v61 = vadd.f32 %v1146_v40, %v2687_v8 }
 0x5dd   : > { %1875 = vmatpush3.bf16.msra.mxu1 %v1810_v39 }
 0x5de   : > { %1876 = vmatprep.subr.bf16.mxu1 %v1811_v18 }
 0x5e1   : > { %1877 = vmatpush3.bf16.msra.mxu1 %v1811_v18 }
 0x5e2   : > { %1878 = vmatprep.subr.bf16.mxu1 %v1812_v48 }
 0x5e5   : > { %1879 = vmatpush3.bf16.msra.mxu1 %v1812_v48 }
 0x64c   : > { %v1386_v51 = vpop.xlane.xlu0 %1385 }
 0x64d   : > { %v1401_v56 = vmul.f32 0.015625, %v1386_v51 }
 0x64f   : > { %v1409_v59 = vadd.f32 1e-05, %v1401_v56  ;;  %v1451_v56 = vadd.f32 %v1152_v10, %v2687_v8 }
 0x650   : > { %v1388_v63 = vpop.xlane.xlu1 %1387 }
 0x651   : > { %1980 = vrsqrt.f32 %v1409_v59  ;;  %v1402_v3 = vmul.f32 0.015625, %v1388_v63  ;;  %v1452_v59 = vadd.f32 %v1156_v17, %v2687_v8 }
 0x653   : > { %v1410_v4 = vadd.f32 1e-05, %v1402_v3  ;;  %v1166_v3 = vadd.f32 %v2493_v15, %v2569_v41 }
 0x654   : > { %v1390_v19 = vpop.xlane.xlu0 %1389 }
 0x655   : > { %1982 = vrsqrt.f32 %v1410_v4  ;;  %v1403_v25 = vmul.f32 0.015625, %v1390_v19 }
 0x657   : > { %v1411_v27 = vadd.f32 1e-05, %v1403_v25 }
 0x658   : > { %v1392_v42 = vpop.xlane.xlu1 %1391 }
 0x659   : > { %1984 = vrsqrt.f32 %v1411_v27  ;;  %v1404_v24 = vmul.f32 0.015625, %v1392_v42 }
 0x65b   : > { %v1981_v5 = vpop.eup %1980  ;;  %v1412_v55 = vadd.f32 1e-05, %v1404_v24 }
 0x65c   : > { %v1394_v31 = vpop.xlane.xlu0 %1393  ;;  %v1425_v20 = vmul.f32 %v1981_v5, %v2511_v33 }
 0x65d   : > { %1986 = vrsqrt.f32 %v1412_v55  ;;  %v1405_v23 = vmul.f32 0.015625, %v1394_v31  ;;  %v1454_v55 = vadd.f32 %v1166_v3, %v2687_v8 }
 0x65e   : > { %v1396_v37 = vpop.xlane.xlu1 %1395  ;;  %v1433_v43 = vmul.f32 %v1425_v20, %v2685_v1 }
 0x65f   : > { %v1983_v44 = vpop.eup %1982  ;;  %v1413_v47 = vadd.f32 1e-05, %v1405_v23  ;;  %v1406_v30 = vmul.f32 0.015625, %v1396_v37  ;;  %v1172_v23 = vadd.f32 %v2495_v32, %v2569_v41  ;;  %v1176_v37 = vadd.f32 %v2497_v35, %v2569_v41  ;;  %v1804_v35 = vld [vmem:[%s2642_s5] ss:$0 sm:$0xff] }
 0x660   : > { %v1426_v28 = vmul.f32 %v1983_v44, %v2516_v0  ;;  %v1441_v57 = vadd.f32 %v1433_v43, %v2686_v53 }
 0x661   : > { %1988 = vrsqrt.f32 %v1413_v47  ;;  %v1414_v50 = vadd.f32 1e-05, %v1406_v30  ;;  %v1455_v40 = vadd.f32 %v1172_v23, %v2687_v8 }
 0x662   : > { %v1434_v33 = vmul.f32 %v1426_v28, %v2685_v1  ;;  %v1457_v38 = vmul.f32 %v1449_v11, %v1441_v57 }
 0x663   : > { %v1985_v58 = vpop.eup %1984  ;;  %1990 = vrsqrt.f32 %v1414_v50 }
 0x664   : > { %v1427_v14 = vmul.f32 %v1985_v58, %v2521_v26  ;;  %v1398_v7 = vpop.xlane.xlu0 %1397  ;;  %v1442_v16 = vadd.f32 %v1434_v33, %v2686_v53 }
 0x665   : > { %v1407_v13 = vmul.f32 0.015625, %v1398_v7 }
 0x666   : > { %v1435_v0 = vmul.f32 %v1427_v14, %v2685_v1  ;;  %v1400_v34 = vpop.xlane.xlu1 %1399  ;;  %v1458_v62 = vmul.f32 %v1450_v61, %v1442_v16 }
 0x667   : > { %v1987_v2 = vpop.eup %1986  ;;  %v1415_v6 = vadd.f32 1e-05, %v1407_v13  ;;  %v1408_v39 = vmul.f32 0.015625, %v1400_v34 }
 0x668   : > { %v1428_v26 = vmul.f32 %v1987_v2, %v2526_v52  ;;  %v1465_v18 = vpack.c.bf16 %v1458_v62, %v1457_v38  ;;  %v1443_v46 = vadd.f32 %v1435_v0, %v2686_v53  ;;  %v1162_v52 = vadd.f32 %v2491_v21, %v2569_v41 }
 0x669   : > { %1992 = vrsqrt.f32 %v1415_v6  ;;  %v1416_v45 = vadd.f32 1e-05, %v1408_v39 }
 0x66a   : > { %v1436_v48 = vmul.f32 %v1428_v26, %v2685_v1  ;;  %1880 = vmatprep.mubr.bf16.mxu1 %v1465_v18  ;;  %v1459_v4 = vmul.f32 %v1451_v56, %v1443_v46 }
 0x66b   : > { %v1989_v51 = vpop.eup %1988  ;;  %1994 = vrsqrt.f32 %v1416_v45 }
 0x66c   : > { %v1444_v54 = vadd.f32 %v1436_v48, %v2686_v53  ;;  %v1429_v60 = vmul.f32 %v1989_v51, %v2531_v22  ;;  %v1453_v22 = vadd.f32 %v1162_v52, %v2687_v8 }
 0x66d   : > { %v1991_v63 = vpop.eup %1990 }
 0x66e   : > { %v1460_v19 = vmul.f32 %v1452_v59, %v1444_v54  ;;  %v1430_v25 = vmul.f32 %v1991_v63, %v2534_v12  ;;  %v1437_v27 = vmul.f32 %v1429_v60, %v2685_v1 }
 0x670   : > { %v1466_v42 = vpack.c.bf16 %v1460_v19, %v1459_v4  ;;  %v1438_v24 = vmul.f32 %v1430_v25, %v2685_v1  ;;  %v1445_v5 = vadd.f32 %v1437_v27, %v2686_v53 }
 0x672   : > { %1881 = vmatmul.mubr.bf16.vlgmr.msra.gmra.mrb[32].mxu1 %v1466_v42  ;;  %v1446_v21 = vadd.f32 %v1438_v24, %v2686_v53  ;;  %v1461_v15 = vmul.f32 %v1453_v22, %v1445_v5 }
 0x673   : > { %v1993_v9 = vpop.eup %1992 }
 0x674   : > { %v1462_v31 = vmul.f32 %v1454_v55, %v1446_v21  ;;  %v1431_v20 = vmul.f32 %v1993_v9, %v2543_v29  ;;  %v1456_v29 = vadd.f32 %v1176_v37, %v2687_v8 }
 0x675   : > { %v1995_v12 = vpop.eup %1994 }
 0x676   : > { %v1467_v43 = vpack.c.bf16 %v1462_v31, %v1461_v15  ;;  %v1432_v44 = vmul.f32 %v1995_v12, %v2548_v36  ;;  %v1439_v47 = vmul.f32 %v1431_v20, %v2685_v1 }
 0x678   : > { %1884 = vmatprep.mubr.bf16.mxu1 %v1467_v43  ;;  %v1440_v30 = vmul.f32 %v1432_v44, %v2685_v1  ;;  %v1447_v49 = vadd.f32 %v1439_v47, %v2686_v53 }
 0x67a   : > { %v1448_v28 = vadd.f32 %v1440_v30, %v2686_v53  ;;  %v1463_v32 = vmul.f32 %v1455_v40, %v1447_v49 }
 0x67c   : > { %v1464_v50 = vmul.f32 %v1456_v29, %v1448_v28 }
 0x67e   : > { %v1468_v33 = vpack.c.bf16 %v1464_v50, %v1463_v32 }
 0x680   : > { %1885 = vmatmul.mubr.bf16.gmra.mrb[36].mxu1 %v1468_v33 }
 0x745   : > { %v1882_v36 = vpop.f32.mrb[32].mxu1 }
 0x746   : > { %v1564_v41 = vadd.f32 %v1882_v36, %v1804_v35  ;;  %v1555_v57 = vpop.f32.mrb[33].mxu1 }
 0x747   : > { %v1556_v1 = vadd.f32 %v1804_v35, %v1555_v57  ;;  %v1883_v58 = vpop.f32.mrb[34].mxu1 }
 0x748   : > { %v1567_v11 = vadd.f32 %v1883_v58, %v1804_v35  ;;  %v1558_v61 = vpop.f32.mrb[35].mxu1  ;;  %v1588_v7 = vmax.f32 %v1564_v41, 0.0 }
 0x749   : > { %v1559_v14 = vadd.f32 %v1804_v35, %v1558_v61  ;;  %v1586_v16 = vmax.f32 %v1556_v1, 0.0 }
 0x74a   : > { %v1589_v8 = vmax.f32 %v1567_v11, 0.0 }
 0x74b   : > { %v1587_v53 = vmax.f32 %v1559_v14, 0.0 }
 0x74c   : > { %v1595_v13 = vpack.c.bf16 %v1589_v8, %v1588_v7 }
 0x74d   : > { %v1594_v0 = vpack.c.bf16 %v1587_v53, %v1586_v16 }
 0x753   : > { %v1886_v34 = vpop.f32.mrb[36].mxu1 }
 0x754   : > { %v1580_v38 = vadd.f32 %v1886_v34, %v1804_v35  ;;  %v1571_v62 = vpop.f32.mrb[37].mxu1 }
 0x755   : > { %v1572_v2 = vadd.f32 %v1804_v35, %v1571_v62  ;;  %v1887_v6 = vpop.f32.mrb[38].mxu1 }
 0x756   : > { %v1583_v39 = vadd.f32 %v1887_v6, %v1804_v35  ;;  %v1574_v10 = vpop.f32.mrb[39].mxu1  ;;  %v1592_v26 = vmax.f32 %v1580_v38, 0.0 }
 0x757   : > { %v1575_v17 = vadd.f32 %v1804_v35, %v1574_v10  ;;  %v1590_v45 = vmax.f32 %v1572_v2, 0.0 }
 0x758   : > { %v1593_v18 = vmax.f32 %v1583_v39, 0.0 }
 0x759   : > { %v1591_v46 = vmax.f32 %v1575_v17, 0.0 }
 0x75a   : > { %v1597_v48 = vpack.c.bf16 %v1593_v18, %v1592_v26 }
 0x75b   : > { %v1596_v51 = vpack.c.bf16 %v1591_v46, %v1590_v45 }
 0x75c   : > { %1635 = vst [vmem:[%s2644_s7] sm:$0xff] %v1594_v0  ;;  %1637 = vst [vmem:[%s2644_s7 + $0x8] sm:$0xff] %v1595_v13 }
 0x75d   : > { %1639 = vst [vmem:[%s2644_s7 + $0x10] sm:$0xff] %v1596_v51  ;;  %1641 = vst [vmem:[%s2644_s7 + $0x18] sm:$0xff] %v1597_v48 }
 0x75e   : > { %1649 = vsyncadd [#allocation13], 512 }
 0x75f   : > { %2004 = dma.done.wait [#allocation13], 512 }
 0x760   : > { %2005 = vsyncadd [#allocation13], 4294966784 }
 0x761 PF: > { %s17_s23 = sadd.s32 1, %s2008_s23  }
 0x762   : > { %p14_p2 = scmp.ge.s32.totalorder %s17_s23, 3  }
 0x764   :  { %16 = sbr.rel (!%p14_p2) target bundleno = 1 (0x1), region = 197 }

</bundles_post_ra>
